<compile_context>
chip_gen: v7x
topology: tpu7x:2x2x1
jax: 0.10.0
libtpu: 0.0.40
codegen_flags: <defaults>
</compile_context>

<pallas_src>
import functools

import jax
import jax.numpy as jnp
from jax.experimental import pallas as pl
from jax.experimental.pallas import tpu as pltpu


# ---------------------------------------------------------------------------
# Pallas kernel (single invocation, no grid)
# ---------------------------------------------------------------------------
def _decoder_vae_kernel(
    z_ref,      # (B_pad, L)        latent (zero-padded batch)
    p1_ref,     # (·, 4E)  packed:  [wih1_t | whh1_t | b1], gate cols [i|f|o|g]
    p2_ref,     # (·, 4H)  packed:  [w2a (E,4H) | w2b (H,4H) | b2]
    ph_ref,     # (·, OPAD) packed: [wh (H,OPAD) | bh], heads [par1|par2|par3|0pad]
    out_ref,    # (T*B_pad, OPAD)   fused output slab, rows ordered t*B_pad + b
    *, T, B, L, E, H, O, offs1, offs2, offsh,
):
    # ---- static slices of the packed weight buffers -------------------------
    wih1 = p1_ref[offs1[0]:offs1[0] + L, :]          # (L, 4E)
    whh1 = p1_ref[offs1[1]:offs1[1] + E, :]          # (E, 4E)
    b1   = p1_ref[offs1[2]:offs1[2] + 1, :]          # (1, 4E)
    w2a  = p2_ref[offs2[0]:offs2[0] + E, :]          # (E, 4H)
    w2b  = p2_ref[offs2[1]:offs2[1] + H, :]          # (H, 4H)
    b2   = p2_ref[offs2[2]:offs2[2] + 1, :]          # (1, 4H)
    wh   = ph_ref[offsh[0]:offsh[0] + H, :]          # (H, OPAD)
    bh   = ph_ref[offsh[1]:offsh[1] + 1, :]          # (1, OPAD)

    # ---- hoisted, time-invariant work ---------------------------------------
    # z is repeated over time, so its input projection (+ bias) is computed once.
    pre1 = jnp.dot(z_ref[...], wih1, preferred_element_type=jnp.float32) + b1

    def sigmoid(x):
        # one EUP tanh instead of exp + divide
        return 0.5 * (1.0 + jnp.tanh(0.5 * x))

    def lstm_cell(gates, c, hid):
        # gate columns pre-ordered [i | f | o | g] in the wrapper
        sig = sigmoid(gates[:, : 3 * hid])
        g = jnp.tanh(gates[:, 3 * hid:])
        i = sig[:, :hid]
        f = sig[:, hid: 2 * hid]
        o = sig[:, 2 * hid:]
        c_new = f * c + i * g
        h_new = o * jnp.tanh(c_new)
        return h_new, c_new

    zeros_e = jnp.zeros((B, E), jnp.float32)
    zeros_h = jnp.zeros((B, H), jnp.float32)

    # ---- t = 0: hidden/cell states are zero, recurrent matmuls drop out -----
    h1, c1 = lstm_cell(pre1, zeros_e, E)
    g2 = jnp.dot(h1, w2a, preferred_element_type=jnp.float32) + b2
    h2, c2 = lstm_cell(g2, zeros_h, H)
    hs = [h2]

    # ---- t = 1 .. T-1: fully unrolled at trace time, states live in vregs ---
    for _ in range(1, T):
        gates1 = pre1 + jnp.dot(h1, whh1, preferred_element_type=jnp.float32)
        h1, c1 = lstm_cell(gates1, c1, E)
        gates2 = (jnp.dot(h1, w2a, preferred_element_type=jnp.float32)
                  + jnp.dot(h2, w2b, preferred_element_type=jnp.float32)
                  + b2)
        h2, c2 = lstm_cell(gates2, c2, H)
        hs.append(h2)

    # ---- fused heads: one matmul over all T*B_pad rows ----------------------
    xs = jnp.concatenate(hs, axis=0)                          # (T*B_pad, H)
    y = jnp.dot(xs, wh, preferred_element_type=jnp.float32) + bh   # (T*B_pad, OPAD)

    # Per-head activations selected by lane index (keeps the store lane-dense):
    #   cols [0,O)    : identity (par1)
    #   cols [O,2O)   : InverseSquareRootLinearUnit (par2)
    #   cols [2O,...) : ClippedTanh (par3; padding lanes are sliced off outside)
    col = jax.lax.broadcasted_iota(jnp.int32, y.shape, 1)
    y_isrlu = 1.0 + 5e-3 + jnp.where(y > 0, y, y * jax.lax.rsqrt(1.0 + y * y))
    y_ctanh = 0.5 * (1.0 + 0.999 * jnp.tanh(y))
    out_ref[...] = jnp.where(col < O, y, jnp.where(col < 2 * O, y_isrlu, y_ctanh))


# ---------------------------------------------------------------------------
# Wrapper: weight prep (reorder / fuse / pack) + pallas_call
# ---------------------------------------------------------------------------
def _reorder_gate_rows(w):
    """PyTorch LSTM gate row blocks [i,f,g,o] -> [i,f,o,g]."""
    hid = w.shape[0] // 4
    i, f, g, o = w[:hid], w[hid:2 * hid], w[2 * hid:3 * hid], w[3 * hid:]
    return jnp.concatenate([i, f, o, g], axis=0)


def _pack_rows(pieces):
    """Stack 2-D pieces along rows; every piece starts at a multiple-of-8 row."""
    offs, rows = [], 0
    for p in pieces:
        rows = ((rows + 7) // 8) * 8
        offs.append(rows)
        rows += p.shape[0]
    width = pieces[0].shape[1]
    out = jnp.zeros((rows, width), jnp.float32)
    for p, o in zip(pieces, offs):
        out = out.at[o:o + p.shape[0]].set(p.astype(jnp.float32))
    return out, tuple(offs)


def prepare_decoder_params(p, *, output_size):
    """PyTorch-layout params -> packed / reordered / fused kernel layout."""
    O = output_size
    H = p["w_hh_1"].shape[1]

    # layer 1 (LSTMdec)
    wih1_t = _reorder_gate_rows(p["w_ih_dec"]).T                       # (L, 4E)
    whh1_t = _reorder_gate_rows(p["w_hh_dec"]).T                       # (E, 4E)
    b1 = _reorder_gate_rows(p["b_ih_dec"] + p["b_hh_dec"])[None, :]    # (1, 4E)
    pack1, offs1 = _pack_rows([wih1_t, whh1_t, b1])

    # layer 2 (LSTM1) — input and recurrent weights kept separate (no concat
    # on the serial path inside the kernel)
    w2a = _reorder_gate_rows(p["w_ih_1"]).T                            # (E, 4H)
    w2b = _reorder_gate_rows(p["w_hh_1"]).T                            # (H, 4H)
    b2 = _reorder_gate_rows(p["b_ih_1"] + p["b_hh_1"])[None, :]        # (1, 4H)
    pack2, offs2 = _pack_rows([w2a, w2b, b2])

    # fused + lane-padded output heads [par1 | par2 | par3 | zeros]
    opad = max(128, ((3 * O + 127) // 128) * 128)
    wh = jnp.zeros((H, opad), jnp.float32)
    wh = (wh.at[:, :O].set(p["w_par1"].T)
            .at[:, O:2 * O].set(p["w_par2"].T)
            .at[:, 2 * O:3 * O].set(p["w_par3"].T))
    bh = jnp.zeros((1, opad), jnp.float32)
    bh = (bh.at[0, :O].set(p["b_par1"])
            .at[0, O:2 * O].set(p["b_par2"])
            .at[0, 2 * O:3 * O].set(p["b_par3"]))
    packh, offsh = _pack_rows([wh, bh])

    return dict(pack1=pack1, pack2=pack2, packh=packh,
                offs1=offs1, offs2=offs2, offsh=offsh, opad=opad)


def decoder_vae_forward(z, kp, *, seq_out, embedding_size, output_size):
    """z: (B, L) float32.  Returns (par1, par2, par3), each (B, T, O)."""
    B, L = z.shape
    E = embedding_size
    H = 2 * E
    O = output_size
    T = seq_out
    OPAD = kp["opad"]

    # pad batch to a full sublane group (>= 8, multiple of 8)
    B_pad = max(8, ((B + 7) // 8) * 8)
    z_pad = jnp.zeros((B_pad, L), jnp.float32).at[:B].set(z.astype(jnp.float32))

    kernel = functools.partial(
        _decoder_vae_kernel, T=T, B=B_pad, L=L, E=E, H=H, O=O,
        offs1=kp["offs1"], offs2=kp["offs2"], offsh=kp["offsh"])

    vmem = pl.BlockSpec(memory_space=pltpu.MemorySpace.VMEM)
    y = pl.pallas_call(
        kernel,
        out_shape=jax.ShapeDtypeStruct((T * B_pad, OPAD), jnp.float32),
        in_specs=[vmem, vmem, vmem, vmem],
        out_specs=vmem,
    )(z_pad, kp["pack1"], kp["pack2"], kp["packh"])

    # rows are ordered t*B_pad + b; drop padded batch rows, go to (B, T, ·)
    y = jnp.transpose(y.reshape(T, B_pad, OPAD)[:, :B, :], (1, 0, 2))
    return y[..., :O], y[..., O:2 * O], y[..., 2 * O:3 * O]


# ---------------------------------------------------------------------------
# Pure-JAX reference (lax.scan) with PyTorch-layout weights
# ---------------------------------------------------------------------------
def _lstm_ref(xseq, w_ih, w_hh, b_ih, b_hh):
    hid = w_hh.shape[1]
    B = xseq.shape[0]
    w_ih_t, w_hh_t = w_ih.T, w_hh.T
    b = b_ih + b_hh

    def step(carry, x_t):
        h, c = carry
        gates = x_t @ w_ih_t + h @ w_hh_t + b
        i = jax.nn.sigmoid(gates[:, :hid])
        f = jax.nn.sigmoid(gates[:, hid:2 * hid])
        g = jnp.tanh(gates[:, 2 * hid:3 * hid])
        o = jax.nn.sigmoid(gates[:, 3 * hid:])
        c = f * c + i * g
        h = o * jnp.tanh(c)
        return (h, c), h

    h0 = jnp.zeros((B, hid), jnp.float32)
    c0 = jnp.zeros((B, hid), jnp.float32)
    _, ys = jax.lax.scan(step, (h0, c0), jnp.swapaxes(xseq, 0, 1))
    return jnp.swapaxes(ys, 0, 1)


def decoder_vae_ref(z, p, *, seq_out):
    zseq = jnp.repeat(z[:, None, :], seq_out, axis=1)
    x = _lstm_ref(zseq, p["w_ih_dec"], p["w_hh_dec"], p["b_ih_dec"], p["b_hh_dec"])
    x = _lstm_ref(x, p["w_ih_1"], p["w_hh_1"], p["b_ih_1"], p["b_hh_1"])
    par1 = x @ p["w_par1"].T + p["b_par1"]
    par2 = x @ p["w_par2"].T + p["b_par2"]
    par3 = x @ p["w_par3"].T + p["b_par3"]
    par2 = 1.0 + 5e-3 + jnp.where(par2 > 0, par2, par2 / jnp.sqrt(1.0 + par2 * par2))
    par3 = 0.5 * (1.0 + 0.999 * jnp.tanh(par3))
    return par1, par2, par3


# ---------------------------------------------------------------------------
# Main
# ---------------------------------------------------------------------------
if __name__ == "__main__":
    seq_out = 8          # T
    embedding_size = 32  # E
    output_size = 16     # O
    latent_dim = 8       # L
    B = 4

    E, H, O, L, T = embedding_size, 2 * embedding_size, output_size, latent_dim, seq_out

    key = jax.random.PRNGKey(0)
    ks = jax.random.split(key, 16)

    def uinit(k, shape, fan):
        bound = 1.0 / jnp.sqrt(fan)
        return jax.random.uniform(k, shape, jnp.float32, -bound, bound)

    torch_params = {
        # LSTMdec: input L -> hidden E  (PyTorch layout (4E, in), rows [i,f,g,o])
        "w_ih_dec": uinit(ks[0], (4 * E, L), E),
        "w_hh_dec": uinit(ks[1], (4 * E, E), E),
        "b_ih_dec": uinit(ks[2], (4 * E,), E),
        "b_hh_dec": uinit(ks[3], (4 * E,), E),
        # LSTM1: input E -> hidden H = 2E
        "w_ih_1": uinit(ks[4], (4 * H, E), H),
        "w_hh_1": uinit(ks[5], (4 * H, H), H),
        "b_ih_1": uinit(ks[6], (4 * H,), H),
        "b_hh_1": uinit(ks[7], (4 * H,), H),
        # output heads (PyTorch Linear layout (O, H))
        "w_par1": uinit(ks[8], (O, H), H),
        "b_par1": uinit(ks[9], (O,), H),
        "w_par2": uinit(ks[10], (O, H), H),
        "b_par2": uinit(ks[11], (O,), H),
        "w_par3": uinit(ks[12], (O, H), H),
        "b_par3": uinit(ks[13], (O,), H),
    }

    z = jax.random.normal(ks[14], (B, L), jnp.float32)

    kp = prepare_decoder_params(torch_params, output_size=O)
    par1, par2, par3 = decoder_vae_forward(
        z, kp, seq_out=T, embedding_size=E, output_size=O)
    par1, par2, par3 = jax.block_until_ready((par1, par2, par3))

    r1, r2, r3 = decoder_vae_ref(z, torch_params, seq_out=T)
    assert par1.shape == (B, T, O) and par2.shape == (B, T, O) and par3.shape == (B, T, O)
    assert jnp.allclose(par1, r1, atol=1e-4, rtol=1e-4), "par1 mismatch"
    assert jnp.allclose(par2, r2, atol=1e-4, rtol=1e-4), "par2 (ISRLU) mismatch"
    assert jnp.allclose(par3, r3, atol=1e-4, rtol=1e-4), "par3 (ClippedTanh) mismatch"

    print("KERNEL_OK")
</pallas_src>

<mosaic_0001>
module attributes {stable_mosaic.version = 11 : i64} {
  func.func @_decoder_vae_kernel(%arg0: memref<8x8xf32, #tpu.memory_space<vmem>>, %arg1: memref<41x128xf32, #tpu.memory_space<vmem>>, %arg2: memref<97x256xf32, #tpu.memory_space<vmem>>, %arg3: memref<65x128xf32, #tpu.memory_space<vmem>>, %arg4: memref<64x128xf32, #tpu.memory_space<vmem>>) attributes {dimension_semantics = [], scalar_prefetch = 0 : i64, scratch_operands = 0 : i64, tpu.core_type = #tpu.core_type<tc>} {
    %c0 = arith.constant 0 : index
    %c0_0 = arith.constant 0 : index
    %0 = vector.load %arg1[%c0, %c0_0] : memref<41x128xf32, #tpu.memory_space<vmem>>, vector<8x128xf32>
    %c8 = arith.constant 8 : index
    %c0_1 = arith.constant 0 : index
    %1 = vector.load %arg1[%c8, %c0_1] : memref<41x128xf32, #tpu.memory_space<vmem>>, vector<32x128xf32>
    %c40 = arith.constant 40 : index
    %c0_2 = arith.constant 0 : index
    %2 = vector.load %arg1[%c40, %c0_2] : memref<41x128xf32, #tpu.memory_space<vmem>>, vector<1x128xf32>
    %c0_3 = arith.constant 0 : index
    %c0_4 = arith.constant 0 : index
    %3 = vector.load %arg2[%c0_3, %c0_4] : memref<97x256xf32, #tpu.memory_space<vmem>>, vector<32x256xf32>
    %c32 = arith.constant 32 : index
    %c0_5 = arith.constant 0 : index
    %4 = vector.load %arg2[%c32, %c0_5] : memref<97x256xf32, #tpu.memory_space<vmem>>, vector<64x256xf32>
    %c96 = arith.constant 96 : index
    %c0_6 = arith.constant 0 : index
    %5 = vector.load %arg2[%c96, %c0_6] : memref<97x256xf32, #tpu.memory_space<vmem>>, vector<1x256xf32>
    %c0_7 = arith.constant 0 : index
    %c0_8 = arith.constant 0 : index
    %6 = vector.load %arg3[%c0_7, %c0_8] : memref<65x128xf32, #tpu.memory_space<vmem>>, vector<64x128xf32>
    %c64 = arith.constant 64 : index
    %c0_9 = arith.constant 0 : index
    %7 = vector.load %arg3[%c64, %c0_9] : memref<65x128xf32, #tpu.memory_space<vmem>>, vector<1x128xf32>
    %c0_10 = arith.constant 0 : index
    %c0_11 = arith.constant 0 : index
    %8 = vector.load %arg0[%c0_10, %c0_11] : memref<8x8xf32, #tpu.memory_space<vmem>>, vector<8x8xf32>
    %cst = arith.constant dense<0.000000e+00> : vector<8x128xf32>
    %9 = tpu.matmul %8, %0, %cst {dimension_numbers = #tpu.dot_dimension_numbers<[1], [0], [0], [1], [0, 0, 1, 1], [], []>} : vector<8x8xf32>, vector<8x128xf32>, vector<8x128xf32> -> vector<8x128xf32>
    %10 = vector.broadcast %2 : vector<1x128xf32> to vector<8x128xf32>
    %11 = arith.addf %9, %10 : vector<8x128xf32>
    %cst_12 = arith.constant 0.000000e+00 : f32
    %12 = vector.broadcast %cst_12 : f32 to vector<8x32xf32>
    %cst_13 = arith.constant 0.000000e+00 : f32
    %13 = vector.broadcast %cst_13 : f32 to vector<8x64xf32>
    %14 = vector.extract_strided_slice %11 {offsets = [0, 0], sizes = [8, 96], strides = [1, 1]} : vector<8x128xf32> to vector<8x96xf32>
    %cst_14 = arith.constant 5.000000e-01 : f32
    %15 = vector.broadcast %cst_14 : f32 to vector<8x96xf32>
    %16 = arith.mulf %15, %14 : vector<8x96xf32>
    %17 = math.tanh %16 : vector<8x96xf32>
    %cst_15 = arith.constant 1.000000e+00 : f32
    %18 = vector.broadcast %cst_15 : f32 to vector<8x96xf32>
    %19 = arith.addf %18, %17 : vector<8x96xf32>
    %cst_16 = arith.constant 5.000000e-01 : f32
    %20 = vector.broadcast %cst_16 : f32 to vector<8x96xf32>
    %21 = arith.mulf %20, %19 : vector<8x96xf32>
    %22 = vector.extract_strided_slice %11 {offsets = [0, 96], sizes = [8, 32], strides = [1, 1]} : vector<8x128xf32> to vector<8x32xf32>
    %23 = math.tanh %22 : vector<8x32xf32>
    %24 = vector.extract_strided_slice %21 {offsets = [0, 0], sizes = [8, 32], strides = [1, 1]} : vector<8x96xf32> to vector<8x32xf32>
    %25 = vector.extract_strided_slice %21 {offsets = [0, 32], sizes = [8, 32], strides = [1, 1]} : vector<8x96xf32> to vector<8x32xf32>
    %26 = vector.extract_strided_slice %21 {offsets = [0, 64], sizes = [8, 32], strides = [1, 1]} : vector<8x96xf32> to vector<8x32xf32>
    %27 = arith.mulf %25, %12 : vector<8x32xf32>
    %28 = arith.mulf %24, %23 : vector<8x32xf32>
    %29 = arith.addf %27, %28 : vector<8x32xf32>
    %30 = math.tanh %29 : vector<8x32xf32>
    %31 = arith.mulf %26, %30 : vector<8x32xf32>
    %cst_17 = arith.constant dense<0.000000e+00> : vector<8x256xf32>
    %32 = tpu.matmul %31, %3, %cst_17 {dimension_numbers = #tpu.dot_dimension_numbers<[1], [0], [0], [1], [0, 0, 1, 1], [], []>} : vector<8x32xf32>, vector<32x256xf32>, vector<8x256xf32> -> vector<8x256xf32>
    %33 = vector.broadcast %5 : vector<1x256xf32> to vector<8x256xf32>
    %34 = arith.addf %32, %33 : vector<8x256xf32>
    %35 = vector.extract_strided_slice %34 {offsets = [0, 0], sizes = [8, 192], strides = [1, 1]} : vector<8x256xf32> to vector<8x192xf32>
    %cst_18 = arith.constant 5.000000e-01 : f32
    %36 = vector.broadcast %cst_18 : f32 to vector<8x192xf32>
    %37 = arith.mulf %36, %35 : vector<8x192xf32>
    %38 = math.tanh %37 : vector<8x192xf32>
    %cst_19 = arith.constant 1.000000e+00 : f32
    %39 = vector.broadcast %cst_19 : f32 to vector<8x192xf32>
    %40 = arith.addf %39, %38 : vector<8x192xf32>
    %cst_20 = arith.constant 5.000000e-01 : f32
    %41 = vector.broadcast %cst_20 : f32 to vector<8x192xf32>
    %42 = arith.mulf %41, %40 : vector<8x192xf32>
    %43 = vector.extract_strided_slice %34 {offsets = [0, 192], sizes = [8, 64], strides = [1, 1]} : vector<8x256xf32> to vector<8x64xf32>
    %44 = math.tanh %43 : vector<8x64xf32>
    %45 = vector.extract_strided_slice %42 {offsets = [0, 0], sizes = [8, 64], strides = [1, 1]} : vector<8x192xf32> to vector<8x64xf32>
    %46 = vector.extract_strided_slice %42 {offsets = [0, 64], sizes = [8, 64], strides = [1, 1]} : vector<8x192xf32> to vector<8x64xf32>
    %47 = vector.extract_strided_slice %42 {offsets = [0, 128], sizes = [8, 64], strides = [1, 1]} : vector<8x192xf32> to vector<8x64xf32>
    %48 = arith.mulf %46, %13 : vector<8x64xf32>
    %49 = arith.mulf %45, %44 : vector<8x64xf32>
    %50 = arith.addf %48, %49 : vector<8x64xf32>
    %51 = math.tanh %50 : vector<8x64xf32>
    %52 = arith.mulf %47, %51 : vector<8x64xf32>
    %cst_21 = arith.constant dense<0.000000e+00> : vector<8x128xf32>
    %53 = tpu.matmul %31, %1, %cst_21 {dimension_numbers = #tpu.dot_dimension_numbers<[1], [0], [0], [1], [0, 0, 1, 1], [], []>} : vector<8x32xf32>, vector<32x128xf32>, vector<8x128xf32> -> vector<8x128xf32>
    %54 = arith.addf %11, %53 : vector<8x128xf32>
    %55 = vector.extract_strided_slice %54 {offsets = [0, 0], sizes = [8, 96], strides = [1, 1]} : vector<8x128xf32> to vector<8x96xf32>
    %cst_22 = arith.constant 5.000000e-01 : f32
    %56 = vector.broadcast %cst_22 : f32 to vector<8x96xf32>
    %57 = arith.mulf %56, %55 : vector<8x96xf32>
    %58 = math.tanh %57 : vector<8x96xf32>
    %cst_23 = arith.constant 1.000000e+00 : f32
    %59 = vector.broadcast %cst_23 : f32 to vector<8x96xf32>
    %60 = arith.addf %59, %58 : vector<8x96xf32>
    %cst_24 = arith.constant 5.000000e-01 : f32
    %61 = vector.broadcast %cst_24 : f32 to vector<8x96xf32>
    %62 = arith.mulf %61, %60 : vector<8x96xf32>
    %63 = vector.extract_strided_slice %54 {offsets = [0, 96], sizes = [8, 32], strides = [1, 1]} : vector<8x128xf32> to vector<8x32xf32>
    %64 = math.tanh %63 : vector<8x32xf32>
    %65 = vector.extract_strided_slice %62 {offsets = [0, 0], sizes = [8, 32], strides = [1, 1]} : vector<8x96xf32> to vector<8x32xf32>
    %66 = vector.extract_strided_slice %62 {offsets = [0, 32], sizes = [8, 32], strides = [1, 1]} : vector<8x96xf32> to vector<8x32xf32>
    %67 = vector.extract_strided_slice %62 {offsets = [0, 64], sizes = [8, 32], strides = [1, 1]} : vector<8x96xf32> to vector<8x32xf32>
    %68 = arith.mulf %66, %29 : vector<8x32xf32>
    %69 = arith.mulf %65, %64 : vector<8x32xf32>
    %70 = arith.addf %68, %69 : vector<8x32xf32>
    %71 = math.tanh %70 : vector<8x32xf32>
    %72 = arith.mulf %67, %71 : vector<8x32xf32>
    %cst_25 = arith.constant dense<0.000000e+00> : vector<8x256xf32>
    %73 = tpu.matmul %72, %3, %cst_25 {dimension_numbers = #tpu.dot_dimension_numbers<[1], [0], [0], [1], [0, 0, 1, 1], [], []>} : vector<8x32xf32>, vector<32x256xf32>, vector<8x256xf32> -> vector<8x256xf32>
    %cst_26 = arith.constant dense<0.000000e+00> : vector<8x256xf32>
    %74 = tpu.matmul %52, %4, %cst_26 {dimension_numbers = #tpu.dot_dimension_numbers<[1], [0], [0], [1], [0, 0, 1, 1], [], []>} : vector<8x64xf32>, vector<64x256xf32>, vector<8x256xf32> -> vector<8x256xf32>
    %75 = arith.addf %73, %74 : vector<8x256xf32>
    %76 = vector.broadcast %5 : vector<1x256xf32> to vector<8x256xf32>
    %77 = arith.addf %75, %76 : vector<8x256xf32>
    %78 = vector.extract_strided_slice %77 {offsets = [0, 0], sizes = [8, 192], strides = [1, 1]} : vector<8x256xf32> to vector<8x192xf32>
    %cst_27 = arith.constant 5.000000e-01 : f32
    %79 = vector.broadcast %cst_27 : f32 to vector<8x192xf32>
    %80 = arith.mulf %79, %78 : vector<8x192xf32>
    %81 = math.tanh %80 : vector<8x192xf32>
    %cst_28 = arith.constant 1.000000e+00 : f32
    %82 = vector.broadcast %cst_28 : f32 to vector<8x192xf32>
    %83 = arith.addf %82, %81 : vector<8x192xf32>
    %cst_29 = arith.constant 5.000000e-01 : f32
    %84 = vector.broadcast %cst_29 : f32 to vector<8x192xf32>
    %85 = arith.mulf %84, %83 : vector<8x192xf32>
    %86 = vector.extract_strided_slice %77 {offsets = [0, 192], sizes = [8, 64], strides = [1, 1]} : vector<8x256xf32> to vector<8x64xf32>
    %87 = math.tanh %86 : vector<8x64xf32>
    %88 = vector.extract_strided_slice %85 {offsets = [0, 0], sizes = [8, 64], strides = [1, 1]} : vector<8x192xf32> to vector<8x64xf32>
    %89 = vector.extract_strided_slice %85 {offsets = [0, 64], sizes = [8, 64], strides = [1, 1]} : vector<8x192xf32> to vector<8x64xf32>
    %90 = vector.extract_strided_slice %85 {offsets = [0, 128], sizes = [8, 64], strides = [1, 1]} : vector<8x192xf32> to vector<8x64xf32>
    %91 = arith.mulf %89, %50 : vector<8x64xf32>
    %92 = arith.mulf %88, %87 : vector<8x64xf32>
    %93 = arith.addf %91, %92 : vector<8x64xf32>
    %94 = math.tanh %93 : vector<8x64xf32>
    %95 = arith.mulf %90, %94 : vector<8x64xf32>
    %cst_30 = arith.constant dense<0.000000e+00> : vector<8x128xf32>
    %96 = tpu.matmul %72, %1, %cst_30 {dimension_numbers = #tpu.dot_dimension_numbers<[1], [0], [0], [1], [0, 0, 1, 1], [], []>} : vector<8x32xf32>, vector<32x128xf32>, vector<8x128xf32> -> vector<8x128xf32>
    %97 = arith.addf %11, %96 : vector<8x128xf32>
    %98 = vector.extract_strided_slice %97 {offsets = [0, 0], sizes = [8, 96], strides = [1, 1]} : vector<8x128xf32> to vector<8x96xf32>
    %cst_31 = arith.constant 5.000000e-01 : f32
    %99 = vector.broadcast %cst_31 : f32 to vector<8x96xf32>
    %100 = arith.mulf %99, %98 : vector<8x96xf32>
    %101 = math.tanh %100 : vector<8x96xf32>
    %cst_32 = arith.constant 1.000000e+00 : f32
    %102 = vector.broadcast %cst_32 : f32 to vector<8x96xf32>
    %103 = arith.addf %102, %101 : vector<8x96xf32>
    %cst_33 = arith.constant 5.000000e-01 : f32
    %104 = vector.broadcast %cst_33 : f32 to vector<8x96xf32>
    %105 = arith.mulf %104, %103 : vector<8x96xf32>
    %106 = vector.extract_strided_slice %97 {offsets = [0, 96], sizes = [8, 32], strides = [1, 1]} : vector<8x128xf32> to vector<8x32xf32>
    %107 = math.tanh %106 : vector<8x32xf32>
    %108 = vector.extract_strided_slice %105 {offsets = [0, 0], sizes = [8, 32], strides = [1, 1]} : vector<8x96xf32> to vector<8x32xf32>
    %109 = vector.extract_strided_slice %105 {offsets = [0, 32], sizes = [8, 32], strides = [1, 1]} : vector<8x96xf32> to vector<8x32xf32>
    %110 = vector.extract_strided_slice %105 {offsets = [0, 64], sizes = [8, 32], strides = [1, 1]} : vector<8x96xf32> to vector<8x32xf32>
    %111 = arith.mulf %109, %70 : vector<8x32xf32>
    %112 = arith.mulf %108, %107 : vector<8x32xf32>
    %113 = arith.addf %111, %112 : vector<8x32xf32>
    %114 = math.tanh %113 : vector<8x32xf32>
    %115 = arith.mulf %110, %114 : vector<8x32xf32>
    %cst_34 = arith.constant dense<0.000000e+00> : vector<8x256xf32>
    %116 = tpu.matmul %115, %3, %cst_34 {dimension_numbers = #tpu.dot_dimension_numbers<[1], [0], [0], [1], [0, 0, 1, 1], [], []>} : vector<8x32xf32>, vector<32x256xf32>, vector<8x256xf32> -> vector<8x256xf32>
    %cst_35 = arith.constant dense<0.000000e+00> : vector<8x256xf32>
    %117 = tpu.matmul %95, %4, %cst_35 {dimension_numbers = #tpu.dot_dimension_numbers<[1], [0], [0], [1], [0, 0, 1, 1], [], []>} : vector<8x64xf32>, vector<64x256xf32>, vector<8x256xf32> -> vector<8x256xf32>
    %118 = arith.addf %116, %117 : vector<8x256xf32>
    %119 = vector.broadcast %5 : vector<1x256xf32> to vector<8x256xf32>
    %120 = arith.addf %118, %119 : vector<8x256xf32>
    %121 = vector.extract_strided_slice %120 {offsets = [0, 0], sizes = [8, 192], strides = [1, 1]} : vector<8x256xf32> to vector<8x192xf32>
    %cst_36 = arith.constant 5.000000e-01 : f32
    %122 = vector.broadcast %cst_36 : f32 to vector<8x192xf32>
    %123 = arith.mulf %122, %121 : vector<8x192xf32>
    %124 = math.tanh %123 : vector<8x192xf32>
    %cst_37 = arith.constant 1.000000e+00 : f32
    %125 = vector.broadcast %cst_37 : f32 to vector<8x192xf32>
    %126 = arith.addf %125, %124 : vector<8x192xf32>
    %cst_38 = arith.constant 5.000000e-01 : f32
    %127 = vector.broadcast %cst_38 : f32 to vector<8x192xf32>
    %128 = arith.mulf %127, %126 : vector<8x192xf32>
    %129 = vector.extract_strided_slice %120 {offsets = [0, 192], sizes = [8, 64], strides = [1, 1]} : vector<8x256xf32> to vector<8x64xf32>
    %130 = math.tanh %129 : vector<8x64xf32>
    %131 = vector.extract_strided_slice %128 {offsets = [0, 0], sizes = [8, 64], strides = [1, 1]} : vector<8x192xf32> to vector<8x64xf32>
    %132 = vector.extract_strided_slice %128 {offsets = [0, 64], sizes = [8, 64], strides = [1, 1]} : vector<8x192xf32> to vector<8x64xf32>
    %133 = vector.extract_strided_slice %128 {offsets = [0, 128], sizes = [8, 64], strides = [1, 1]} : vector<8x192xf32> to vector<8x64xf32>
    %134 = arith.mulf %132, %93 : vector<8x64xf32>
    %135 = arith.mulf %131, %130 : vector<8x64xf32>
    %136 = arith.addf %134, %135 : vector<8x64xf32>
    %137 = math.tanh %136 : vector<8x64xf32>
    %138 = arith.mulf %133, %137 : vector<8x64xf32>
    %cst_39 = arith.constant dense<0.000000e+00> : vector<8x128xf32>
    %139 = tpu.matmul %115, %1, %cst_39 {dimension_numbers = #tpu.dot_dimension_numbers<[1], [0], [0], [1], [0, 0, 1, 1], [], []>} : vector<8x32xf32>, vector<32x128xf32>, vector<8x128xf32> -> vector<8x128xf32>
    %140 = arith.addf %11, %139 : vector<8x128xf32>
    %141 = vector.extract_strided_slice %140 {offsets = [0, 0], sizes = [8, 96], strides = [1, 1]} : vector<8x128xf32> to vector<8x96xf32>
    %cst_40 = arith.constant 5.000000e-01 : f32
    %142 = vector.broadcast %cst_40 : f32 to vector<8x96xf32>
    %143 = arith.mulf %142, %141 : vector<8x96xf32>
    %144 = math.tanh %143 : vector<8x96xf32>
    %cst_41 = arith.constant 1.000000e+00 : f32
    %145 = vector.broadcast %cst_41 : f32 to vector<8x96xf32>
    %146 = arith.addf %145, %144 : vector<8x96xf32>
    %cst_42 = arith.constant 5.000000e-01 : f32
    %147 = vector.broadcast %cst_42 : f32 to vector<8x96xf32>
    %148 = arith.mulf %147, %146 : vector<8x96xf32>
    %149 = vector.extract_strided_slice %140 {offsets = [0, 96], sizes = [8, 32], strides = [1, 1]} : vector<8x128xf32> to vector<8x32xf32>
    %150 = math.tanh %149 : vector<8x32xf32>
    %151 = vector.extract_strided_slice %148 {offsets = [0, 0], sizes = [8, 32], strides = [1, 1]} : vector<8x96xf32> to vector<8x32xf32>
    %152 = vector.extract_strided_slice %148 {offsets = [0, 32], sizes = [8, 32], strides = [1, 1]} : vector<8x96xf32> to vector<8x32xf32>
    %153 = vector.extract_strided_slice %148 {offsets = [0, 64], sizes = [8, 32], strides = [1, 1]} : vector<8x96xf32> to vector<8x32xf32>
    %154 = arith.mulf %152, %113 : vector<8x32xf32>
    %155 = arith.mulf %151, %150 : vector<8x32xf32>
    %156 = arith.addf %154, %155 : vector<8x32xf32>
    %157 = math.tanh %156 : vector<8x32xf32>
    %158 = arith.mulf %153, %157 : vector<8x32xf32>
    %cst_43 = arith.constant dense<0.000000e+00> : vector<8x256xf32>
    %159 = tpu.matmul %158, %3, %cst_43 {dimension_numbers = #tpu.dot_dimension_numbers<[1], [0], [0], [1], [0, 0, 1, 1], [], []>} : vector<8x32xf32>, vector<32x256xf32>, vector<8x256xf32> -> vector<8x256xf32>
    %cst_44 = arith.constant dense<0.000000e+00> : vector<8x256xf32>
    %160 = tpu.matmul %138, %4, %cst_44 {dimension_numbers = #tpu.dot_dimension_numbers<[1], [0], [0], [1], [0, 0, 1, 1], [], []>} : vector<8x64xf32>, vector<64x256xf32>, vector<8x256xf32> -> vector<8x256xf32>
    %161 = arith.addf %159, %160 : vector<8x256xf32>
    %162 = vector.broadcast %5 : vector<1x256xf32> to vector<8x256xf32>
    %163 = arith.addf %161, %162 : vector<8x256xf32>
    %164 = vector.extract_strided_slice %163 {offsets = [0, 0], sizes = [8, 192], strides = [1, 1]} : vector<8x256xf32> to vector<8x192xf32>
    %cst_45 = arith.constant 5.000000e-01 : f32
    %165 = vector.broadcast %cst_45 : f32 to vector<8x192xf32>
    %166 = arith.mulf %165, %164 : vector<8x192xf32>
    %167 = math.tanh %166 : vector<8x192xf32>
    %cst_46 = arith.constant 1.000000e+00 : f32
    %168 = vector.broadcast %cst_46 : f32 to vector<8x192xf32>
    %169 = arith.addf %168, %167 : vector<8x192xf32>
    %cst_47 = arith.constant 5.000000e-01 : f32
    %170 = vector.broadcast %cst_47 : f32 to vector<8x192xf32>
    %171 = arith.mulf %170, %169 : vector<8x192xf32>
    %172 = vector.extract_strided_slice %163 {offsets = [0, 192], sizes = [8, 64], strides = [1, 1]} : vector<8x256xf32> to vector<8x64xf32>
    %173 = math.tanh %172 : vector<8x64xf32>
    %174 = vector.extract_strided_slice %171 {offsets = [0, 0], sizes = [8, 64], strides = [1, 1]} : vector<8x192xf32> to vector<8x64xf32>
    %175 = vector.extract_strided_slice %171 {offsets = [0, 64], sizes = [8, 64], strides = [1, 1]} : vector<8x192xf32> to vector<8x64xf32>
    %176 = vector.extract_strided_slice %171 {offsets = [0, 128], sizes = [8, 64], strides = [1, 1]} : vector<8x192xf32> to vector<8x64xf32>
    %177 = arith.mulf %175, %136 : vector<8x64xf32>
    %178 = arith.mulf %174, %173 : vector<8x64xf32>
    %179 = arith.addf %177, %178 : vector<8x64xf32>
    %180 = math.tanh %179 : vector<8x64xf32>
    %181 = arith.mulf %176, %180 : vector<8x64xf32>
    %cst_48 = arith.constant dense<0.000000e+00> : vector<8x128xf32>
    %182 = tpu.matmul %158, %1, %cst_48 {dimension_numbers = #tpu.dot_dimension_numbers<[1], [0], [0], [1], [0, 0, 1, 1], [], []>} : vector<8x32xf32>, vector<32x128xf32>, vector<8x128xf32> -> vector<8x128xf32>
    %183 = arith.addf %11, %182 : vector<8x128xf32>
    %184 = vector.extract_strided_slice %183 {offsets = [0, 0], sizes = [8, 96], strides = [1, 1]} : vector<8x128xf32> to vector<8x96xf32>
    %cst_49 = arith.constant 5.000000e-01 : f32
    %185 = vector.broadcast %cst_49 : f32 to vector<8x96xf32>
    %186 = arith.mulf %185, %184 : vector<8x96xf32>
    %187 = math.tanh %186 : vector<8x96xf32>
    %cst_50 = arith.constant 1.000000e+00 : f32
    %188 = vector.broadcast %cst_50 : f32 to vector<8x96xf32>
    %189 = arith.addf %188, %187 : vector<8x96xf32>
    %cst_51 = arith.constant 5.000000e-01 : f32
    %190 = vector.broadcast %cst_51 : f32 to vector<8x96xf32>
    %191 = arith.mulf %190, %189 : vector<8x96xf32>
    %192 = vector.extract_strided_slice %183 {offsets = [0, 96], sizes = [8, 32], strides = [1, 1]} : vector<8x128xf32> to vector<8x32xf32>
    %193 = math.tanh %192 : vector<8x32xf32>
    %194 = vector.extract_strided_slice %191 {offsets = [0, 0], sizes = [8, 32], strides = [1, 1]} : vector<8x96xf32> to vector<8x32xf32>
    %195 = vector.extract_strided_slice %191 {offsets = [0, 32], sizes = [8, 32], strides = [1, 1]} : vector<8x96xf32> to vector<8x32xf32>
    %196 = vector.extract_strided_slice %191 {offsets = [0, 64], sizes = [8, 32], strides = [1, 1]} : vector<8x96xf32> to vector<8x32xf32>
    %197 = arith.mulf %195, %156 : vector<8x32xf32>
    %198 = arith.mulf %194, %193 : vector<8x32xf32>
    %199 = arith.addf %197, %198 : vector<8x32xf32>
    %200 = math.tanh %199 : vector<8x32xf32>
    %201 = arith.mulf %196, %200 : vector<8x32xf32>
    %cst_52 = arith.constant dense<0.000000e+00> : vector<8x256xf32>
    %202 = tpu.matmul %201, %3, %cst_52 {dimension_numbers = #tpu.dot_dimension_numbers<[1], [0], [0], [1], [0, 0, 1, 1], [], []>} : vector<8x32xf32>, vector<32x256xf32>, vector<8x256xf32> -> vector<8x256xf32>
    %cst_53 = arith.constant dense<0.000000e+00> : vector<8x256xf32>
    %203 = tpu.matmul %181, %4, %cst_53 {dimension_numbers = #tpu.dot_dimension_numbers<[1], [0], [0], [1], [0, 0, 1, 1], [], []>} : vector<8x64xf32>, vector<64x256xf32>, vector<8x256xf32> -> vector<8x256xf32>
    %204 = arith.addf %202, %203 : vector<8x256xf32>
    %205 = vector.broadcast %5 : vector<1x256xf32> to vector<8x256xf32>
    %206 = arith.addf %204, %205 : vector<8x256xf32>
    %207 = vector.extract_strided_slice %206 {offsets = [0, 0], sizes = [8, 192], strides = [1, 1]} : vector<8x256xf32> to vector<8x192xf32>
    %cst_54 = arith.constant 5.000000e-01 : f32
    %208 = vector.broadcast %cst_54 : f32 to vector<8x192xf32>
    %209 = arith.mulf %208, %207 : vector<8x192xf32>
    %210 = math.tanh %209 : vector<8x192xf32>
    %cst_55 = arith.constant 1.000000e+00 : f32
    %211 = vector.broadcast %cst_55 : f32 to vector<8x192xf32>
    %212 = arith.addf %211, %210 : vector<8x192xf32>
    %cst_56 = arith.constant 5.000000e-01 : f32
    %213 = vector.broadcast %cst_56 : f32 to vector<8x192xf32>
    %214 = arith.mulf %213, %212 : vector<8x192xf32>
    %215 = vector.extract_strided_slice %206 {offsets = [0, 192], sizes = [8, 64], strides = [1, 1]} : vector<8x256xf32> to vector<8x64xf32>
    %216 = math.tanh %215 : vector<8x64xf32>
    %217 = vector.extract_strided_slice %214 {offsets = [0, 0], sizes = [8, 64], strides = [1, 1]} : vector<8x192xf32> to vector<8x64xf32>
    %218 = vector.extract_strided_slice %214 {offsets = [0, 64], sizes = [8, 64], strides = [1, 1]} : vector<8x192xf32> to vector<8x64xf32>
    %219 = vector.extract_strided_slice %214 {offsets = [0, 128], sizes = [8, 64], strides = [1, 1]} : vector<8x192xf32> to vector<8x64xf32>
    %220 = arith.mulf %218, %179 : vector<8x64xf32>
    %221 = arith.mulf %217, %216 : vector<8x64xf32>
    %222 = arith.addf %220, %221 : vector<8x64xf32>
    %223 = math.tanh %222 : vector<8x64xf32>
    %224 = arith.mulf %219, %223 : vector<8x64xf32>
    %cst_57 = arith.constant dense<0.000000e+00> : vector<8x128xf32>
    %225 = tpu.matmul %201, %1, %cst_57 {dimension_numbers = #tpu.dot_dimension_numbers<[1], [0], [0], [1], [0, 0, 1, 1], [], []>} : vector<8x32xf32>, vector<32x128xf32>, vector<8x128xf32> -> vector<8x128xf32>
    %226 = arith.addf %11, %225 : vector<8x128xf32>
    %227 = vector.extract_strided_slice %226 {offsets = [0, 0], sizes = [8, 96], strides = [1, 1]} : vector<8x128xf32> to vector<8x96xf32>
    %cst_58 = arith.constant 5.000000e-01 : f32
    %228 = vector.broadcast %cst_58 : f32 to vector<8x96xf32>
    %229 = arith.mulf %228, %227 : vector<8x96xf32>
    %230 = math.tanh %229 : vector<8x96xf32>
    %cst_59 = arith.constant 1.000000e+00 : f32
    %231 = vector.broadcast %cst_59 : f32 to vector<8x96xf32>
    %232 = arith.addf %231, %230 : vector<8x96xf32>
    %cst_60 = arith.constant 5.000000e-01 : f32
    %233 = vector.broadcast %cst_60 : f32 to vector<8x96xf32>
    %234 = arith.mulf %233, %232 : vector<8x96xf32>
    %235 = vector.extract_strided_slice %226 {offsets = [0, 96], sizes = [8, 32], strides = [1, 1]} : vector<8x128xf32> to vector<8x32xf32>
    %236 = math.tanh %235 : vector<8x32xf32>
    %237 = vector.extract_strided_slice %234 {offsets = [0, 0], sizes = [8, 32], strides = [1, 1]} : vector<8x96xf32> to vector<8x32xf32>
    %238 = vector.extract_strided_slice %234 {offsets = [0, 32], sizes = [8, 32], strides = [1, 1]} : vector<8x96xf32> to vector<8x32xf32>
    %239 = vector.extract_strided_slice %234 {offsets = [0, 64], sizes = [8, 32], strides = [1, 1]} : vector<8x96xf32> to vector<8x32xf32>
    %240 = arith.mulf %238, %199 : vector<8x32xf32>
    %241 = arith.mulf %237, %236 : vector<8x32xf32>
    %242 = arith.addf %240, %241 : vector<8x32xf32>
    %243 = math.tanh %242 : vector<8x32xf32>
    %244 = arith.mulf %239, %243 : vector<8x32xf32>
    %cst_61 = arith.constant dense<0.000000e+00> : vector<8x256xf32>
    %245 = tpu.matmul %244, %3, %cst_61 {dimension_numbers = #tpu.dot_dimension_numbers<[1], [0], [0], [1], [0, 0, 1, 1], [], []>} : vector<8x32xf32>, vector<32x256xf32>, vector<8x256xf32> -> vector<8x256xf32>
    %cst_62 = arith.constant dense<0.000000e+00> : vector<8x256xf32>
    %246 = tpu.matmul %224, %4, %cst_62 {dimension_numbers = #tpu.dot_dimension_numbers<[1], [0], [0], [1], [0, 0, 1, 1], [], []>} : vector<8x64xf32>, vector<64x256xf32>, vector<8x256xf32> -> vector<8x256xf32>
    %247 = arith.addf %245, %246 : vector<8x256xf32>
    %248 = vector.broadcast %5 : vector<1x256xf32> to vector<8x256xf32>
    %249 = arith.addf %247, %248 : vector<8x256xf32>
    %250 = vector.extract_strided_slice %249 {offsets = [0, 0], sizes = [8, 192], strides = [1, 1]} : vector<8x256xf32> to vector<8x192xf32>
    %cst_63 = arith.constant 5.000000e-01 : f32
    %251 = vector.broadcast %cst_63 : f32 to vector<8x192xf32>
    %252 = arith.mulf %251, %250 : vector<8x192xf32>
    %253 = math.tanh %252 : vector<8x192xf32>
    %cst_64 = arith.constant 1.000000e+00 : f32
    %254 = vector.broadcast %cst_64 : f32 to vector<8x192xf32>
    %255 = arith.addf %254, %253 : vector<8x192xf32>
    %cst_65 = arith.constant 5.000000e-01 : f32
    %256 = vector.broadcast %cst_65 : f32 to vector<8x192xf32>
    %257 = arith.mulf %256, %255 : vector<8x192xf32>
    %258 = vector.extract_strided_slice %249 {offsets = [0, 192], sizes = [8, 64], strides = [1, 1]} : vector<8x256xf32> to vector<8x64xf32>
    %259 = math.tanh %258 : vector<8x64xf32>
    %260 = vector.extract_strided_slice %257 {offsets = [0, 0], sizes = [8, 64], strides = [1, 1]} : vector<8x192xf32> to vector<8x64xf32>
    %261 = vector.extract_strided_slice %257 {offsets = [0, 64], sizes = [8, 64], strides = [1, 1]} : vector<8x192xf32> to vector<8x64xf32>
    %262 = vector.extract_strided_slice %257 {offsets = [0, 128], sizes = [8, 64], strides = [1, 1]} : vector<8x192xf32> to vector<8x64xf32>
    %263 = arith.mulf %261, %222 : vector<8x64xf32>
    %264 = arith.mulf %260, %259 : vector<8x64xf32>
    %265 = arith.addf %263, %264 : vector<8x64xf32>
    %266 = math.tanh %265 : vector<8x64xf32>
    %267 = arith.mulf %262, %266 : vector<8x64xf32>
    %cst_66 = arith.constant dense<0.000000e+00> : vector<8x128xf32>
    %268 = tpu.matmul %244, %1, %cst_66 {dimension_numbers = #tpu.dot_dimension_numbers<[1], [0], [0], [1], [0, 0, 1, 1], [], []>} : vector<8x32xf32>, vector<32x128xf32>, vector<8x128xf32> -> vector<8x128xf32>
    %269 = arith.addf %11, %268 : vector<8x128xf32>
    %270 = vector.extract_strided_slice %269 {offsets = [0, 0], sizes = [8, 96], strides = [1, 1]} : vector<8x128xf32> to vector<8x96xf32>
    %cst_67 = arith.constant 5.000000e-01 : f32
    %271 = vector.broadcast %cst_67 : f32 to vector<8x96xf32>
    %272 = arith.mulf %271, %270 : vector<8x96xf32>
    %273 = math.tanh %272 : vector<8x96xf32>
    %cst_68 = arith.constant 1.000000e+00 : f32
    %274 = vector.broadcast %cst_68 : f32 to vector<8x96xf32>
    %275 = arith.addf %274, %273 : vector<8x96xf32>
    %cst_69 = arith.constant 5.000000e-01 : f32
    %276 = vector.broadcast %cst_69 : f32 to vector<8x96xf32>
    %277 = arith.mulf %276, %275 : vector<8x96xf32>
    %278 = vector.extract_strided_slice %269 {offsets = [0, 96], sizes = [8, 32], strides = [1, 1]} : vector<8x128xf32> to vector<8x32xf32>
    %279 = math.tanh %278 : vector<8x32xf32>
    %280 = vector.extract_strided_slice %277 {offsets = [0, 0], sizes = [8, 32], strides = [1, 1]} : vector<8x96xf32> to vector<8x32xf32>
    %281 = vector.extract_strided_slice %277 {offsets = [0, 32], sizes = [8, 32], strides = [1, 1]} : vector<8x96xf32> to vector<8x32xf32>
    %282 = vector.extract_strided_slice %277 {offsets = [0, 64], sizes = [8, 32], strides = [1, 1]} : vector<8x96xf32> to vector<8x32xf32>
    %283 = arith.mulf %281, %242 : vector<8x32xf32>
    %284 = arith.mulf %280, %279 : vector<8x32xf32>
    %285 = arith.addf %283, %284 : vector<8x32xf32>
    %286 = math.tanh %285 : vector<8x32xf32>
    %287 = arith.mulf %282, %286 : vector<8x32xf32>
    %cst_70 = arith.constant dense<0.000000e+00> : vector<8x256xf32>
    %288 = tpu.matmul %287, %3, %cst_70 {dimension_numbers = #tpu.dot_dimension_numbers<[1], [0], [0], [1], [0, 0, 1, 1], [], []>} : vector<8x32xf32>, vector<32x256xf32>, vector<8x256xf32> -> vector<8x256xf32>
    %cst_71 = arith.constant dense<0.000000e+00> : vector<8x256xf32>
    %289 = tpu.matmul %267, %4, %cst_71 {dimension_numbers = #tpu.dot_dimension_numbers<[1], [0], [0], [1], [0, 0, 1, 1], [], []>} : vector<8x64xf32>, vector<64x256xf32>, vector<8x256xf32> -> vector<8x256xf32>
    %290 = arith.addf %288, %289 : vector<8x256xf32>
    %291 = vector.broadcast %5 : vector<1x256xf32> to vector<8x256xf32>
    %292 = arith.addf %290, %291 : vector<8x256xf32>
    %293 = vector.extract_strided_slice %292 {offsets = [0, 0], sizes = [8, 192], strides = [1, 1]} : vector<8x256xf32> to vector<8x192xf32>
    %cst_72 = arith.constant 5.000000e-01 : f32
    %294 = vector.broadcast %cst_72 : f32 to vector<8x192xf32>
    %295 = arith.mulf %294, %293 : vector<8x192xf32>
    %296 = math.tanh %295 : vector<8x192xf32>
    %cst_73 = arith.constant 1.000000e+00 : f32
    %297 = vector.broadcast %cst_73 : f32 to vector<8x192xf32>
    %298 = arith.addf %297, %296 : vector<8x192xf32>
    %cst_74 = arith.constant 5.000000e-01 : f32
    %299 = vector.broadcast %cst_74 : f32 to vector<8x192xf32>
    %300 = arith.mulf %299, %298 : vector<8x192xf32>
    %301 = vector.extract_strided_slice %292 {offsets = [0, 192], sizes = [8, 64], strides = [1, 1]} : vector<8x256xf32> to vector<8x64xf32>
    %302 = math.tanh %301 : vector<8x64xf32>
    %303 = vector.extract_strided_slice %300 {offsets = [0, 0], sizes = [8, 64], strides = [1, 1]} : vector<8x192xf32> to vector<8x64xf32>
    %304 = vector.extract_strided_slice %300 {offsets = [0, 64], sizes = [8, 64], strides = [1, 1]} : vector<8x192xf32> to vector<8x64xf32>
    %305 = vector.extract_strided_slice %300 {offsets = [0, 128], sizes = [8, 64], strides = [1, 1]} : vector<8x192xf32> to vector<8x64xf32>
    %306 = arith.mulf %304, %265 : vector<8x64xf32>
    %307 = arith.mulf %303, %302 : vector<8x64xf32>
    %308 = arith.addf %306, %307 : vector<8x64xf32>
    %309 = math.tanh %308 : vector<8x64xf32>
    %310 = arith.mulf %305, %309 : vector<8x64xf32>
    %cst_75 = arith.constant dense<0.000000e+00> : vector<8x128xf32>
    %311 = tpu.matmul %287, %1, %cst_75 {dimension_numbers = #tpu.dot_dimension_numbers<[1], [0], [0], [1], [0, 0, 1, 1], [], []>} : vector<8x32xf32>, vector<32x128xf32>, vector<8x128xf32> -> vector<8x128xf32>
    %312 = arith.addf %11, %311 : vector<8x128xf32>
    %313 = vector.extract_strided_slice %312 {offsets = [0, 0], sizes = [8, 96], strides = [1, 1]} : vector<8x128xf32> to vector<8x96xf32>
    %cst_76 = arith.constant 5.000000e-01 : f32
    %314 = vector.broadcast %cst_76 : f32 to vector<8x96xf32>
    %315 = arith.mulf %314, %313 : vector<8x96xf32>
    %316 = math.tanh %315 : vector<8x96xf32>
    %cst_77 = arith.constant 1.000000e+00 : f32
    %317 = vector.broadcast %cst_77 : f32 to vector<8x96xf32>
    %318 = arith.addf %317, %316 : vector<8x96xf32>
    %cst_78 = arith.constant 5.000000e-01 : f32
    %319 = vector.broadcast %cst_78 : f32 to vector<8x96xf32>
    %320 = arith.mulf %319, %318 : vector<8x96xf32>
    %321 = vector.extract_strided_slice %312 {offsets = [0, 96], sizes = [8, 32], strides = [1, 1]} : vector<8x128xf32> to vector<8x32xf32>
    %322 = math.tanh %321 : vector<8x32xf32>
    %323 = vector.extract_strided_slice %320 {offsets = [0, 0], sizes = [8, 32], strides = [1, 1]} : vector<8x96xf32> to vector<8x32xf32>
    %324 = vector.extract_strided_slice %320 {offsets = [0, 32], sizes = [8, 32], strides = [1, 1]} : vector<8x96xf32> to vector<8x32xf32>
    %325 = vector.extract_strided_slice %320 {offsets = [0, 64], sizes = [8, 32], strides = [1, 1]} : vector<8x96xf32> to vector<8x32xf32>
    %326 = arith.mulf %324, %285 : vector<8x32xf32>
    %327 = arith.mulf %323, %322 : vector<8x32xf32>
    %328 = arith.addf %326, %327 : vector<8x32xf32>
    %329 = math.tanh %328 : vector<8x32xf32>
    %330 = arith.mulf %325, %329 : vector<8x32xf32>
    %cst_79 = arith.constant dense<0.000000e+00> : vector<8x256xf32>
    %331 = tpu.matmul %330, %3, %cst_79 {dimension_numbers = #tpu.dot_dimension_numbers<[1], [0], [0], [1], [0, 0, 1, 1], [], []>} : vector<8x32xf32>, vector<32x256xf32>, vector<8x256xf32> -> vector<8x256xf32>
    %cst_80 = arith.constant dense<0.000000e+00> : vector<8x256xf32>
    %332 = tpu.matmul %310, %4, %cst_80 {dimension_numbers = #tpu.dot_dimension_numbers<[1], [0], [0], [1], [0, 0, 1, 1], [], []>} : vector<8x64xf32>, vector<64x256xf32>, vector<8x256xf32> -> vector<8x256xf32>
    %333 = arith.addf %331, %332 : vector<8x256xf32>
    %334 = vector.broadcast %5 : vector<1x256xf32> to vector<8x256xf32>
    %335 = arith.addf %333, %334 : vector<8x256xf32>
    %336 = vector.extract_strided_slice %335 {offsets = [0, 0], sizes = [8, 192], strides = [1, 1]} : vector<8x256xf32> to vector<8x192xf32>
    %cst_81 = arith.constant 5.000000e-01 : f32
    %337 = vector.broadcast %cst_81 : f32 to vector<8x192xf32>
    %338 = arith.mulf %337, %336 : vector<8x192xf32>
    %339 = math.tanh %338 : vector<8x192xf32>
    %cst_82 = arith.constant 1.000000e+00 : f32
    %340 = vector.broadcast %cst_82 : f32 to vector<8x192xf32>
    %341 = arith.addf %340, %339 : vector<8x192xf32>
    %cst_83 = arith.constant 5.000000e-01 : f32
    %342 = vector.broadcast %cst_83 : f32 to vector<8x192xf32>
    %343 = arith.mulf %342, %341 : vector<8x192xf32>
    %344 = vector.extract_strided_slice %335 {offsets = [0, 192], sizes = [8, 64], strides = [1, 1]} : vector<8x256xf32> to vector<8x64xf32>
    %345 = math.tanh %344 : vector<8x64xf32>
    %346 = vector.extract_strided_slice %343 {offsets = [0, 0], sizes = [8, 64], strides = [1, 1]} : vector<8x192xf32> to vector<8x64xf32>
    %347 = vector.extract_strided_slice %343 {offsets = [0, 64], sizes = [8, 64], strides = [1, 1]} : vector<8x192xf32> to vector<8x64xf32>
    %348 = vector.extract_strided_slice %343 {offsets = [0, 128], sizes = [8, 64], strides = [1, 1]} : vector<8x192xf32> to vector<8x64xf32>
    %349 = arith.mulf %347, %308 : vector<8x64xf32>
    %350 = arith.mulf %346, %345 : vector<8x64xf32>
    %351 = arith.addf %349, %350 : vector<8x64xf32>
    %352 = math.tanh %351 : vector<8x64xf32>
    %353 = arith.mulf %348, %352 : vector<8x64xf32>
    %354 = tpu.concatenate %52, %95, %138, %181, %224, %267, %310, %353 in 0 : vector<8x64xf32>, vector<8x64xf32>, vector<8x64xf32>, vector<8x64xf32>, vector<8x64xf32>, vector<8x64xf32>, vector<8x64xf32>, vector<8x64xf32> -> vector<64x64xf32>
    %cst_84 = arith.constant dense<0.000000e+00> : vector<64x128xf32>
    %355 = tpu.matmul %354, %6, %cst_84 {dimension_numbers = #tpu.dot_dimension_numbers<[1], [0], [0], [1], [0, 0, 1, 1], [], []>} : vector<64x64xf32>, vector<64x128xf32>, vector<64x128xf32> -> vector<64x128xf32>
    %356 = vector.broadcast %7 : vector<1x128xf32> to vector<64x128xf32>
    %357 = arith.addf %355, %356 : vector<64x128xf32>
    %358 = tpu.iota {dimensions = array<i32: 1>} : vector<64x128xi32>
    %cst_85 = arith.constant 0.000000e+00 : f32
    %359 = vector.broadcast %cst_85 : f32 to vector<64x128xf32>
    %360 = arith.cmpf ogt, %357, %359 : vector<64x128xf32>
    %361 = arith.mulf %357, %357 : vector<64x128xf32>
    %cst_86 = arith.constant 1.000000e+00 : f32
    %362 = vector.broadcast %cst_86 : f32 to vector<64x128xf32>
    %363 = arith.addf %362, %361 : vector<64x128xf32>
    %364 = math.rsqrt %363 : vector<64x128xf32>
    %365 = arith.mulf %357, %364 : vector<64x128xf32>
    %366 = arith.select %360, %357, %365 : vector<64x128xi1>, vector<64x128xf32>
    %cst_87 = arith.constant 1.005000e+00 : f32
    %367 = vector.broadcast %cst_87 : f32 to vector<64x128xf32>
    %368 = arith.addf %367, %366 : vector<64x128xf32>
    %369 = math.tanh %357 : vector<64x128xf32>
    %cst_88 = arith.constant 9.990000e-01 : f32
    %370 = vector.broadcast %cst_88 : f32 to vector<64x128xf32>
    %371 = arith.mulf %370, %369 : vector<64x128xf32>
    %cst_89 = arith.constant 1.000000e+00 : f32
    %372 = vector.broadcast %cst_89 : f32 to vector<64x128xf32>
    %373 = arith.addf %372, %371 : vector<64x128xf32>
    %cst_90 = arith.constant 5.000000e-01 : f32
    %374 = vector.broadcast %cst_90 : f32 to vector<64x128xf32>
    %375 = arith.mulf %374, %373 : vector<64x128xf32>
    %c16_i32 = arith.constant 16 : i32
    %376 = vector.broadcast %c16_i32 : i32 to vector<64x128xi32>
    %377 = arith.cmpi slt, %358, %376 : vector<64x128xi32>
    %c32_i32 = arith.constant 32 : i32
    %378 = vector.broadcast %c32_i32 : i32 to vector<64x128xi32>
    %379 = arith.cmpi slt, %358, %378 : vector<64x128xi32>
    %380 = arith.select %379, %368, %375 : vector<64x128xi1>, vector<64x128xf32>
    %381 = arith.select %377, %357, %380 : vector<64x128xi1>, vector<64x128xf32>
    %c0_91 = arith.constant 0 : index
    %c0_92 = arith.constant 0 : index
    %382 = vector.load %arg4[%c0_91, %c0_92] : memref<64x128xf32, #tpu.memory_space<vmem>>, vector<64x128xf32>
    tpu.vector_store %arg4[%c0_91, %c0_92], %381 {strides = array<i32>} : memref<64x128xf32, #tpu.memory_space<vmem>>, vector<64x128xf32>,
    return
  }
}

</mosaic_0001>

<bundles_post_ra>
// kernel: tpu_custom_call.1
= control target key start
LH: loop header
LB: loop body
LE: loop exit
PB: predicated region body
PF: predicated region fallthrough
CT: control target
= control target key end

     0   :  { %9 = vsyncpa [#allocation3], 0  ;;  %s3784_s0 = inlined_call_operand.hbm [shape: f32[8,8], index: 0, kind: input, shape index: {}]   ;;  %s3785_s1 = inlined_call_operand.hbm [shape: f32[41,128], index: 1, kind: input, shape index: {}]   ;;  %s3786_s2 = inlined_call_operand.hbm [shape: f32[97,256], index: 2, kind: input, shape index: {}]   ;;  %s3787_s3 = inlined_call_operand.hbm [shape: f32[65,128], index: 3, kind: input, shape index: {}]   ;;  %s3788_s4 = inlined_call_operand.hbm [shape: f32[64,128], index: 4, kind: output, shape index: {}]  }
   0x1   :  { %10 = vsyncpa [#allocation6], 0 }
   0x2   :  { %11 = vsyncpa [#allocation9], 0 }
   0x3   :  { %12 = vsyncpa [#allocation4], 0  ;;  %s3192_s15 = smov [#allocation5]   ;;  %s3074_s19 = scalar_lea.hbm %s3785_s1, 768 }
   0x4   :  { %s28_s16 = sshll.u32 %s3192_s15, 4  ;;  %p3075_p0 = scmp.ne.s32.totalorder %s3785_s1, %s3074_s19  ;;  %s29_s16 = int_to_ptr.vmem [resolvable:$true] %s28_s16 }
   0x5   :  { %p3078_p1 = scmp.lt.u32.totalorder %s3074_s19, %s3785_s1 }
   0x7   :  { %p3080_p2 = pnand %p3078_p1, %p3075_p0 }
   0x9   :  { %3083 = shalt.err (!%p3080_p2)
}
   0xa   :  { %s3084_s24 = scalar_lea.vmem %s29_s16, 768  ;;  %p3089_p4 = scmp.lt.s32.totalorder %s29_s16, %s29_s16 }
   0xb   :  { %p3085_p3 = scmp.ne.s32.totalorder %s29_s16, %s3084_s24  ;;  %p3090_p5 = scmp.lt.s32.totalorder %s3084_s24, %s3084_s24 }
   0xd   :  { %p3091_p6 = por %p3090_p5, %p3089_p4 }
   0xf   :  { %p3092_p7 = pnand %p3091_p6, %p3085_p3 }
  0x11   :  { %3095 = shalt.err (!%p3092_p7)
}
  0x12   :  { %s3193_s25 = smov 128   ;;  %s3194_s26 = smov 8  }
  0x13   :  { %34 = dma.hbm_to_vmem [thread:$0]  %s3785_s1, 768, %s29_s16, [#allocation6], %s3193_s25, %s3193_s25, %s3194_s26  }
  0x14   :  { %s3195_s29 = smov [#allocation2]   ;;  %s3196_s5 = smov [#allocation7]  }
  0x15   :  { %s19_s30 = sshll.u32 %s3195_s29, 4  ;;  %s40_s6 = sshll.u32 %s3196_s5, 4  ;;  %s20_s30 = int_to_ptr.vmem [resolvable:$true] %s19_s30  ;;  %s41_s6 = int_to_ptr.vmem [resolvable:$true] %s40_s6 }
  0x16   :  { %s3096_s9 = scalar_lea.hbm %s3784_s0, 128 }
  0x17   :  { %p3097_p8 = scmp.ne.s32.totalorder %s3784_s0, %s3096_s9  ;;  %p3100_p9 = scmp.lt.u32.totalorder %s3096_s9, %s3784_s0 }
  0x19   :  { %p3102_p10 = pnand %p3100_p9, %p3097_p8 }
  0x1b   :  { %3105 = shalt.err (!%p3102_p10)
}
  0x1c   :  { %s3106_s1 = scalar_lea.vmem %s20_s30, 128  ;;  %p3111_p12 = scmp.lt.s32.totalorder %s20_s30, %s20_s30 }
  0x1d   :  { %p3107_p11 = scmp.ne.s32.totalorder %s20_s30, %s3106_s1  ;;  %p3112_p13 = scmp.lt.s32.totalorder %s3106_s1, %s3106_s1 }
  0x1f   :  { %p3113_p0 = por %p3112_p13, %p3111_p12 }
  0x21   :  { %p3114_p1 = pnand %p3113_p0, %p3107_p11 }
  0x23   :  { %3117 = shalt.err (!%p3114_p1)
}
  0x24   :  { %22 = dma.hbm_to_vmem [thread:$0]  %s3784_s0, 128, %s20_s30, [#allocation3]  }
  0x25   :  { %s3118_s18 = scalar_lea.hbm %s3786_s2, 3328 }
  0x26   :  { %p3119_p2 = scmp.ne.s32.totalorder %s3786_s2, %s3118_s18  ;;  %p3122_p3 = scmp.lt.u32.totalorder %s3118_s18, %s3786_s2 }
  0x28   :  { %p3124_p4 = pnand %p3122_p3, %p3119_p2 }
  0x2a   :  { %3127 = shalt.err (!%p3124_p4)
}
  0x2b   :  { %s3128_s23 = scalar_lea.vmem %s41_s6, 3328  ;;  %p3133_p6 = scmp.lt.s32.totalorder %s41_s6, %s41_s6 }
  0x2c   :  { %p3129_p5 = scmp.ne.s32.totalorder %s41_s6, %s3128_s23  ;;  %p3134_p7 = scmp.lt.s32.totalorder %s3128_s23, %s3128_s23 }
  0x2e   :  { %p3135_p8 = por %p3134_p7, %p3133_p6 }
  0x30   :  { %p3136_p9 = pnand %p3135_p8, %p3129_p5 }
  0x32   :  { %3139 = shalt.err (!%p3136_p9)
}
  0x33   :  { %s3197_s0 = smov 256   ;;  %s3198_s24 = smov 16  }
  0x34   :  { %46 = dma.hbm_to_vmem [thread:$0]  %s3786_s2, 3328, %s41_s6, [#allocation6], %s3197_s0, %s3197_s0, %s3198_s24  }
  0x35   :  { %s3199_s29 = smov [#allocation8]   ;;  %s3140_s8 = scalar_lea.hbm %s3787_s3, 1152 }
  0x36   :  { %s52_s30 = sshll.u32 %s3199_s29, 4  ;;  %p3141_p10 = scmp.ne.s32.totalorder %s3787_s3, %s3140_s8  ;;  %s53_s30 = int_to_ptr.vmem [resolvable:$true] %s52_s30 }
  0x37   :  { %p3144_p11 = scmp.lt.u32.totalorder %s3140_s8, %s3787_s3 }
  0x39   :  { %p3146_p12 = pnand %p3144_p11, %p3141_p10 }
  0x3b   :  { %3149 = shalt.err (!%p3146_p12)
}
  0x3c   :  { %s3150_s13 = scalar_lea.vmem %s53_s30, 1152  ;;  %p3155_p0 = scmp.lt.s32.totalorder %s53_s30, %s53_s30 }
  0x3d   :  { %p3151_p13 = scmp.ne.s32.totalorder %s53_s30, %s3150_s13  ;;  %p3156_p1 = scmp.lt.s32.totalorder %s3150_s13, %s3150_s13 }
  0x3f   :  { %p3157_p2 = por %p3156_p1, %p3155_p0 }
  0x41   :  { %p3158_p3 = pnand %p3157_p2, %p3151_p13 }
  0x43   :  { %3161 = shalt.err (!%p3158_p3)
}
  0x44   :  { %58 = dma.hbm_to_vmem [thread:$0]  %s3787_s3, 1152, %s53_s30, [#allocation9], %s3193_s25, %s3193_s25, %s3194_s26  }
  0x45   :  { %3184 = dma.done.wait [#allocation3], 128  }
  0x46   :  { %3185 = vsyncadd [#allocation3], 4294967168 }
  0x47   :  { %3186 = dma.done.wait [#allocation6], 4096  }
  0x48   :  { %3187 = vsyncadd [#allocation6], 4294963200 }
  0x49   :  { %3188 = dma.done.wait [#allocation9], 1152  }
  0x4a   :  { %3189 = vsyncadd [#allocation9], 4294966144  ;;  %v3200_v0 = vmov 0.0   ;;  %vm3201_vm0 = vmmov 0   ;;  %vm117_vm1 = vcmask 64512   ;;  %v71_v1 = vld [vmem:[#allocation5] sm:$0xff]  ;;  %v214_v52 = vlaneseq }
  0x4b   :  { %2558 = vmatprep.subr.mxu1 %v3200_v0  ;;  %2560 = vmatprep.mubr.msk.f32.mxu1 %vm3201_vm0, %v3200_v0  ;;  %v112_v2 = vld [vmem:[#allocation2] sm:$0xff]  ;;  %v2472_v3 = vld [vmem:[#allocation5 + $0x28] ss:$0 sm:$0xff]  ;;  %s3202_s3 = smov 32   ;;  %v77_v19 = vld [vmem:[#allocation7] sm:$0xff]  ;;  %v3203_v21 = vmov 0.0|0.0  }
  0x4c   :  { %2571 = vmatprep.mubr.msk.f32.mxu0 %vm3201_vm0, %v3200_v0  ;;  %2559 = vmatpush3.msra.mxu1 %v71_v1  ;;  %v78_v17 = vld [vmem:[#allocation7 + $0x8] sm:$0xff]  ;;  %v80_v18 = vld [vmem:[#allocation7 + $0x18] sm:$0xff]  ;;  %v79_v22 = vld [vmem:[#allocation7 + $0x10] sm:$0xff]  ;;  %s3204_s1 = smov 64   ;;  %vm227_vm2 = vcmask 261120   ;;  %v215_v53 = vshrl.u32 %v214_v52, 7 }
  0x4d   :  { %2561 = vmatmul.mubr.msk.f32.vlgmr.msra.gmra.mrb[0].mxu1 %vm117_vm1, %v112_v2  ;;  %v3300_v20 = vpack.c.bf16 %v80_v18, %v78_v17  ;;  %2676 = vmatprep.subr.bf16.mxu0 %v3203_v21  ;;  %v72_v23 = vld [vmem:[#allocation5 + $0x8] sm:$0xff]  ;;  %v73_v24 = vld [vmem:[#allocation5 + $0x10] sm:$0xff]  ;;  %v3303_v25 = vpack.c.bf16 %v79_v22, %v77_v19  ;;  %v82_v27 = vld [vmem:[#allocation7 + $0x28] sm:$0xff]  ;;  %vm420_vm3 = vcmask 523264   ;;  %s3205_s14 = smov [#allocation10]  }
  0x4e   :  { %294 = vmatprep.mubr.f32.mxu1 %v3200_v0  ;;  %v3305_v26 = vpack.c.bf16 %v73_v24, %v72_v23  ;;  %v84_v28 = vld [vmem:[#allocation7 + $0x38] sm:$0xff]  ;;  %v81_v29 = vld [vmem:[#allocation7 + $0x20] sm:$0xff]  ;;  %v83_v31 = vld [vmem:[#allocation7 + $0x30] sm:$0xff]  ;;  %v220_v54 = vsub.s32 1, %v215_v53  ;;  %v216_v63 = vsub.s32 0, %v215_v53  ;;  %s2458_s15 = sshll.u32 %s3205_s14, 4  ;;  %s2459_s15 = int_to_ptr.vmem [resolvable:$true] %s2458_s15 }
  0x4f   :  { %2669 = vmatprep.subr.bf16.mxu1 %v3300_v20  ;;  %v3308_v30 = vpack.c.bf16 %v84_v28, %v82_v27  ;;  %v74_v32 = vld [vmem:[#allocation5 + $0x18] sm:$0xff]  ;;  %v75_v33 = vld [vmem:[#allocation5 + $0x20] sm:$0xff]  ;;  %v3312_v34 = vpack.c.bf16 %v83_v31, %v81_v29  ;;  %v92_v18 = vld [vmem:[#allocation7 + $0x78] sm:$0xff]  ;;  %s3162_s16 = scalar_lea.vmem %s2459_s15, 1024  ;;  %p3167_p5 = scmp.lt.s32.totalorder %s2459_s15, %s2459_s15 }
  0x50   :  { %2671 = vmatpush1.bf16.msra.mxu1 %v3303_v25  ;;  %2678 = vmatpush3.bf16.msra.mxu0 %v3305_v26  ;;  %v3314_v35 = vpack.c.bf16 %v75_v33, %v74_v32  ;;  %v102_v55 = vld [vmem:[#allocation7 + $0xc0] ss:$8 sm:$0x3]  ;;  %v91_v24 = vld [vmem:[#allocation7 + $0x70] sm:$0xff]  ;;  %v96_v28 = vld [vmem:[#allocation7 + $0x98] sm:$0xff]  ;;  %p3163_p4 = scmp.ne.s32.totalorder %s2459_s15, %s3162_s16  ;;  %p3168_p6 = scmp.lt.s32.totalorder %s3162_s16, %s3162_s16 }
  0x51   :  { %2673 = vmatprep.subr.bf16.mxu1 %v3308_v30  ;;  %2679 = vmatprep.subr.bf16.mxu0 %v3203_v21  ;;  %v3335_v56 = vrot.slane %v102_v55, %v220_v54  ;;  %v3347_v1 = vrot.slane %v102_v55, %v216_v63  ;;  %v90_v17 = vld [vmem:[#allocation7 + $0x68] sm:$0xff]  ;;  %v89_v23 = vld [vmem:[#allocation7 + $0x60] sm:$0xff]  ;;  %v95_v33 = vld [vmem:[#allocation7 + $0x90] sm:$0xff] }
  0x52   :  { %v3356_v22 = vpack.c.bf16 %v92_v18, %v90_v17  ;;  %v94_v27 = vld [vmem:[#allocation7 + $0x88] sm:$0xff]  ;;  %v3361_v29 = vpack.c.bf16 %v91_v24, %v89_v23  ;;  %v93_v32 = vld [vmem:[#allocation7 + $0x80] sm:$0xff]  ;;  %p3169_p7 = por %p3168_p6, %p3167_p5 }
  0x53   :  { %v3364_v31 = vpack.c.bf16 %v96_v28, %v94_v27 }
  0x54   :  { %2675 = vmatpush1.bf16.msra.mxu1 %v3312_v34  ;;  %2681 = vmatpush3.bf16.msra.mxu0 %v3314_v35  ;;  %p3170_p8 = pnand %p3169_p7, %p3163_p4 }
  0x55   :  { %2706 = vmatprep.subr.bf16.mxu0 %v3203_v21 }
 0x120   :  { %v187_v4 = vpop.f32.mrb[0].mxu1 }
 0x121   :  { %v3291_v5 = vadd.f32 %v2472_v3, %v187_v4  ;;  %v2562_v6 = vpop.f32.mrb[1].mxu1 }
 0x123   :  { %2930 = vtanh.f32 %v3291_v5  ;;  %v191_v8 = vmul.f32 0.5, %v3291_v5 }
 0x125   :  { %2932 = vtanh.f32 %v191_v8 }
 0x12d   :  { %v2931_v7 = vpop.eup %2930 }
 0x12e   :  { %198 = vrot.lane.b32.xlu0 %v2931_v7, %s3202_s3 }
 0x12f   :  { %v2933_v9 = vpop.eup %2932 }
 0x130   :  { %v193_v10 = vadd.f32 1.0, %v2933_v9 }
 0x132   :  { %v194_v11 = vmul.f32 0.5, %v193_v10 }
 0x134   :  { %v196_v14 = vmul.f32 0.0, %v194_v11 }
 0x1a0   :  { %v199_v12 = vpop.permute.xlu0 %198 }
 0x1a1   :  { %v201_v13 = vmul.f32 %v199_v12, %v194_v11  ;;  %v86_v12 = vld [vmem:[#allocation7 + $0x48] sm:$0xff] }
 0x1a3   :  { %203 = vrot.lane.b32.xlu0 %v201_v13, %s3202_s3  ;;  %v88_v13 = vld [vmem:[#allocation7 + $0x58] sm:$0xff] }
 0x215   :  { %v204_v15 = vpop.permute.xlu0 %203 }
 0x216   :  { %v3297_v16 = vadd.f32 %v204_v15, %v196_v14  ;;  %v85_v14 = vld [vmem:[#allocation7 + $0x40] sm:$0xff]  ;;  %v3352_v15 = vpack.c.bf16 %v88_v13, %v86_v12 }
 0x218   :  { %2934 = vtanh.f32 %v3297_v16  ;;  %2683 = vmatprep.subr.bf16.mxu1 %v3352_v15 }
 0x222   :  { %v2935_v36 = vpop.eup %2934 }
 0x223   :  { %209 = vrot.lane.b32.xlu1 %v2935_v36, %s3202_s3  ;;  %v98_v36 = vld [vmem:[#allocation7 + $0xa8] sm:$0xff] }
 0x295   :  { %v210_v37 = vpop.permute.xlu1 %209 }
 0x296   :  { %v212_v38 = vmul.f32 %v210_v37, %v194_v11  ;;  %v100_v37 = vld [vmem:[#allocation7 + $0xb8] sm:$0xff] }
 0x298   :  { %225 = vrot.lane.b32.xlu1 %v212_v38, %s3204_s1  ;;  %v3367_v38 = vpack.c.bf16 %v95_v33, %v93_v32 }
 0x30a   :  { %v226_v39 = vpop.permute.xlu1 %225 }
 0x30b   :  { %2474 = vmatmul.mubr.msk.f32.vlgmr.msra.gmra.mrb[2].mxu1 %vm227_vm2, %v226_v39  ;;  %2572 = vmatmul.mubr.msk.f32.vlgmr.msra.gmra.mrb[0].mxu0 %vm227_vm2, %v226_v39  ;;  %v3370_v39 = vpack.c.bf16 %v100_v37, %v98_v36 }
 0x30c   :  { %2708 = vmatpush3.bf16.msra.mxu0 %v3305_v26  ;;  %2582 = vmatprep.mubr.msk.f32.mxu0 %vm3201_vm0, %v3200_v0 }
 0x30d   :  { %2709 = vmatprep.subr.bf16.mxu0 %v3203_v21  ;;  %488 = vmatprep.mubr.f32.mxu1 %v3200_v0 }
 0x310   :  { %2711 = vmatpush3.bf16.msra.mxu0 %v3314_v35 }
 0x311   :  { %2713 = vmatprep.subr.bf16.mxu0 %v3352_v15 }
 0x3de   :  { %v296_v40 = vpop.f32.mrb[2].mxu1  ;;  %v393_v41 = vpop.f32.mrb[0].mxu0 }
 0x3df   :  { %v397_v42 = vadd.f32 %v393_v41, %v3291_v5  ;;  %v298_v43 = vpop.f32.mrb[3].mxu1  ;;  %v2573_v44 = vpop.f32.mrb[1].mxu0  ;;  %v297_v2 = vadd.f32 %v296_v40, %v3347_v1  ;;  %v97_v40 = vld [vmem:[#allocation7 + $0xa0] sm:$0xff]  ;;  %v99_v41 = vld [vmem:[#allocation7 + $0xb0] sm:$0xff] }
 0x3e0   :  { %v3341_v60 = vadd.f32 %v298_v43, %v3335_v56 }
 0x3e1   :  { %2936 = vtanh.f32 %v397_v42  ;;  %v398_v46 = vmul.f32 0.5, %v397_v42  ;;  %v301_v3 = vmul.f32 0.5, %v297_v2  ;;  %v3373_v42 = vpack.c.bf16 %v99_v41, %v97_v40 }
 0x3e3   :  { %2938 = vtanh.f32 %v398_v46 }
 0x3eb   :  { %v2937_v45 = vpop.eup %2936 }
 0x3ec   :  { %405 = vrot.lane.b32.xlu0 %v2937_v45, %s3202_s3 }
 0x3ed   :  { %v2939_v47 = vpop.eup %2938 }
 0x3ee   :  { %v400_v48 = vadd.f32 1.0, %v2939_v47 }
 0x3f0   :  { %v401_v49 = vmul.f32 0.5, %v400_v48  ;;  %v302_v48 = vmul.f32 0.5, %v3341_v60 }
 0x3f2   :  { %v403_v57 = vmul.f32 %v401_v49, %v3297_v16  ;;  %v87_v16 = vld [vmem:[#allocation7 + $0x50] sm:$0xff] }
 0x3f3   :  { %v3354_v19 = vpack.c.bf16 %v87_v16, %v85_v14 }
 0x3f5   :  { %2685 = vmatpush1.bf16.msra.mxu1 %v3354_v19 }
 0x3f6   :  { %2687 = vmatprep.subr.bf16.mxu1 %v3356_v22 }
 0x3f9   :  { %2689 = vmatpush1.bf16.msra.mxu1 %v3361_v29 }
 0x3fa   :  { %2691 = vmatprep.subr.bf16.mxu1 %v3364_v31 }
 0x3fd   :  { %2693 = vmatpush1.bf16.msra.mxu1 %v3367_v38 }
 0x3fe   :  { %2695 = vmatprep.subr.bf16.mxu1 %v3370_v39 }
 0x401   :  { %2697 = vmatpush1.bf16.msra.mxu1 %v3373_v42 }
 0x402   :  { %2699 = vmatprep.subr.bf16.mxu1 %v3300_v20 }
 0x45e   :  { %v406_v50 = vpop.permute.xlu0 %405 }
 0x45f   :  { %v408_v51 = vmul.f32 %v406_v50, %v401_v49 }
 0x461   :  { %410 = vrot.lane.b32.xlu1 %v408_v51, %s3202_s3 }
 0x4d3   :  { %v411_v58 = vpop.permute.xlu1 %410 }
 0x4d4   :  { %v3338_v59 = vadd.f32 %v411_v58, %v403_v57 }
 0x4d6   :  { %2940 = vtanh.f32 %v3338_v59 }
 0x4d7   :  { %2942 = vtanh.f32 %v3341_v60 }
 0x4d8   :  { %2944 = vtanh.f32 %v301_v3 }
 0x4e0   :  { %v2941_v61 = vpop.eup %2940 }
 0x4e1   :  { %416 = vrot.lane.b32.xlu0 %v2941_v61, %s3202_s3  ;;  %v2943_v62 = vpop.eup %2942 }
 0x4e2   :  { %v2945_v4 = vpop.eup %2944 }
 0x4e3   :  { %v305_v6 = vadd.f32 1.0, %v2945_v4 }
 0x4e5   :  { %312 = vrot.lane.b32.xlu0 %v2943_v62, %s3204_s1  ;;  %v307_v9 = vmul.f32 0.5, %v305_v6 }
 0x4e7   :  { %v310_v44 = vmul.f32 0.0, %v307_v9 }
 0x553   :  { %v417_v7 = vpop.permute.xlu0 %416 }
 0x554   :  { %v419_v8 = vmul.f32 %v417_v7, %v401_v49 }
 0x556   :  { %496 = vrot.lane.b32.xlu1 %v419_v8, %s3204_s1 }
 0x557   :  { %v313_v10 = vpop.permute.xlu0 %312 }
 0x558   :  { %v315_v11 = vmul.f32 %v313_v10, %v307_v9 }
 0x55a   :  { %317 = vrot.lane.b32.xlu1 %v315_v11, %s3204_s1 }
 0x5c8   :  { %v497_v43 = vpop.permute.xlu1 %496 }
 0x5c9   :  { %2583 = vmatmul.mubr.msk.f32.vlgmr.msra.gmra.mrb[2].mxu0 %vm227_vm2, %v497_v43 }
 0x5ca   :  { %2715 = vmatpush1.bf16.msra.mxu0 %v3354_v19  ;;  %759 = vmatprep.mubr.f32.mxu0 %v3200_v0 }
 0x5cb   :  { %2717 = vmatprep.subr.bf16.mxu0 %v3356_v22 }
 0x5cc   :  { %v318_v45 = vpop.permute.xlu1 %317 }
 0x5cd   :  { %v3382_v46 = vadd.f32 %v318_v45, %v310_v44 }
 0x5ce   :  { %2719 = vmatpush1.bf16.msra.mxu0 %v3361_v29 }
 0x5cf   :  { %2946 = vtanh.f32 %v3382_v46  ;;  %2721 = vmatprep.subr.bf16.mxu0 %v3364_v31 }
 0x5d0   :  { %2948 = vtanh.f32 %v302_v48 }
 0x5d2   :  { %2723 = vmatpush1.bf16.msra.mxu0 %v3367_v38 }
 0x5d3   :  { %2725 = vmatprep.subr.bf16.mxu0 %v3370_v39 }
 0x5d6   :  { %2727 = vmatpush1.bf16.msra.mxu0 %v3373_v42 }
 0x5d7   :  { %2729 = vmatprep.subr.bf16.mxu0 %v3300_v20 }
 0x5d9   :  { %v2947_v47 = vpop.eup %2946 }
 0x5da   :  { %323 = vrot.lane.b32.xlu1 %v2947_v47, %s3204_s1  ;;  %v2949_v49 = vpop.eup %2948 }
 0x5db   :  { %v306_v50 = vadd.f32 1.0, %v2949_v49 }
 0x5dd   :  { %v308_v51 = vmul.f32 0.5, %v306_v50 }
 0x64c   :  { %v324_v53 = vpop.permute.xlu1 %323 }
 0x64d   :  { %v3393_v54 = vmul.f32 %v324_v53, %v308_v51 }
 0x64f   :  { %2476 = vmatmul.mubr.msk.f32.vlgmr.msra.gmra.mrb[4].mxu1 %vm420_vm3, %v3393_v54 }
 0x650   :  { %2701 = vmatpush1.bf16.msra.mxu1 %v3303_v25  ;;  %564 = vmatprep.mubr.f32.mxu1 %v3200_v0 }
 0x651   :  { %2703 = vmatprep.subr.bf16.mxu1 %v3308_v30 }
 0x654   :  { %2705 = vmatpush1.bf16.msra.mxu1 %v3312_v34 }
 0x655   :  { %2736 = vmatprep.subr.bf16.mxu1 %v3203_v21 }
 0x657   :  { %2477 = vmatmul.mubr.msk.f32.vlgmr.msra.gmra.mrb[4].mxu1 %vm227_vm2, %v497_v43 }
 0x658   :  { %2738 = vmatpush3.bf16.msra.mxu1 %v3305_v26  ;;  %2593 = vmatprep.mubr.msk.f32.mxu1 %vm3201_vm0, %v3200_v0 }
 0x659   :  { %2739 = vmatprep.subr.bf16.mxu1 %v3203_v21 }
 0x65c   :  { %2741 = vmatpush3.bf16.msra.mxu1 %v3314_v35 }
 0x65d   :  { %2743 = vmatprep.subr.bf16.mxu1 %v3352_v15 }
 0x69c   :  { %v665_v55 = vpop.f32.mrb[2].mxu0 }
 0x69d   :  { %v669_v57 = vadd.f32 %v665_v55, %v3291_v5  ;;  %v2584_v58 = vpop.f32.mrb[3].mxu0 }
 0x69f   :  { %2950 = vtanh.f32 %v669_v57  ;;  %v670_v61 = vmul.f32 0.5, %v669_v57 }
 0x6a1   :  { %2952 = vtanh.f32 %v670_v61 }
 0x6a9   :  { %v2951_v60 = vpop.eup %2950 }
 0x6aa   :  { %677 = vrot.lane.b32.xlu0 %v2951_v60, %s3202_s3 }
 0x6ab   :  { %v2953_v62 = vpop.eup %2952 }
 0x6ac   :  { %v672_v63 = vadd.f32 1.0, %v2953_v62 }
 0x6ae   :  { %v673_v2 = vmul.f32 0.5, %v672_v63 }
 0x6b0   :  { %v675_v8 = vmul.f32 %v673_v2, %v3338_v59 }
 0x71c   :  { %v678_v3 = vpop.permute.xlu0 %677 }
 0x71d   :  { %v680_v4 = vmul.f32 %v678_v3, %v673_v2 }
 0x71f   :  { %682 = vrot.lane.b32.xlu0 %v680_v4, %s3202_s3 }
 0x72a   :  { %v566_v6 = vpop.f32.mrb[4].mxu1 }
 0x72b   :  { %v568_v7 = vpop.f32.mrb[5].mxu1  ;;  %v571_v14 = vadd.f32 %v566_v6, %v3347_v1 }
 0x72c   :  { %v572_v11 = vadd.f32 %v568_v7, %v3335_v56 }
 0x72d   :  { %v573_v16 = vmul.f32 0.5, %v571_v14 }
 0x72e   :  { %v574_v41 = vmul.f32 0.5, %v572_v11 }
 0x791   :  { %v683_v9 = vpop.permute.xlu0 %682 }
 0x792   :  { %v3413_v10 = vadd.f32 %v683_v9, %v675_v8 }
 0x794   :  { %2954 = vtanh.f32 %v3413_v10 }
 0x795   :  { %2956 = vtanh.f32 %v572_v11 }
 0x796   :  { %2958 = vtanh.f32 %v573_v16 }
 0x79e   :  { %v2955_v12 = vpop.eup %2954 }
 0x79f   :  { %688 = vrot.lane.b32.xlu1 %v2955_v12, %s3202_s3  ;;  %v2957_v13 = vpop.eup %2956 }
 0x7a0   :  { %v2959_v17 = vpop.eup %2958 }
 0x7a1   :  { %v577_v59 = vadd.f32 1.0, %v2959_v17 }
 0x7a3   :  { %584 = vrot.lane.b32.xlu1 %v2957_v13, %s3204_s1  ;;  %v579_v24 = vmul.f32 0.5, %v577_v59 }
 0x7a5   :  { %v582_v33 = vmul.f32 %v579_v24, %v3382_v46 }
 0x811   :  { %v689_v18 = vpop.permute.xlu1 %688 }
 0x812   :  { %v691_v23 = vmul.f32 %v689_v18, %v673_v2 }
 0x814   :  { %767 = vrot.lane.b32.xlu0 %v691_v23, %s3204_s1 }
 0x815   :  { %v585_v27 = vpop.permute.xlu1 %584 }
 0x816   :  { %v587_v28 = vmul.f32 %v585_v27, %v579_v24 }
 0x818   :  { %589 = vrot.lane.b32.xlu0 %v587_v28, %s3204_s1 }
 0x886   :  { %v768_v32 = vpop.permute.xlu0 %767 }
 0x887   :  { %2594 = vmatmul.mubr.msk.f32.vlgmr.msra.gmra.mrb[6].mxu1 %vm227_vm2, %v768_v32 }
 0x888   :  { %2745 = vmatpush1.bf16.msra.mxu1 %v3354_v19  ;;  %1030 = vmatprep.mubr.f32.mxu1 %v3200_v0 }
 0x889   :  { %2747 = vmatprep.subr.bf16.mxu1 %v3356_v22 }
 0x88a   :  { %v590_v36 = vpop.permute.xlu0 %589 }
 0x88b   :  { %v3427_v37 = vadd.f32 %v590_v36, %v582_v33 }
 0x88c   :  { %2749 = vmatpush1.bf16.msra.mxu1 %v3361_v29 }
 0x88d   :  { %2960 = vtanh.f32 %v3427_v37  ;;  %2751 = vmatprep.subr.bf16.mxu1 %v3364_v31 }
 0x88e   :  { %2962 = vtanh.f32 %v574_v41 }
 0x890   :  { %2753 = vmatpush1.bf16.msra.mxu1 %v3367_v38 }
 0x891   :  { %2755 = vmatprep.subr.bf16.mxu1 %v3370_v39 }
 0x894   :  { %2757 = vmatpush1.bf16.msra.mxu1 %v3373_v42 }
 0x895   :  { %2759 = vmatprep.subr.bf16.mxu1 %v3300_v20 }
 0x897   :  { %v2961_v40 = vpop.eup %2960 }
 0x898   :  { %595 = vrot.lane.b32.xlu1 %v2961_v40, %s3204_s1  ;;  %v2963_v43 = vpop.eup %2962 }
 0x899   :  { %v578_v44 = vadd.f32 1.0, %v2963_v43 }
 0x89b   :  { %v580_v45 = vmul.f32 0.5, %v578_v44 }
 0x90a   :  { %v596_v46 = vpop.permute.xlu1 %595 }
 0x90b   :  { %v3437_v47 = vmul.f32 %v596_v46, %v580_v45 }
 0x90d   :  { %2479 = vmatmul.mubr.msk.f32.vlgmr.msra.gmra.mrb[4].mxu0 %vm420_vm3, %v3437_v47 }
 0x90e   :  { %2731 = vmatpush1.bf16.msra.mxu0 %v3303_v25  ;;  %835 = vmatprep.mubr.f32.mxu0 %v3200_v0 }
 0x90f   :  { %2733 = vmatprep.subr.bf16.mxu0 %v3308_v30 }
 0x912   :  { %2735 = vmatpush1.bf16.msra.mxu0 %v3312_v34 }
 0x913   :  { %2766 = vmatprep.subr.bf16.mxu0 %v3203_v21 }
 0x915   :  { %2480 = vmatmul.mubr.msk.f32.vlgmr.msra.gmra.mrb[4].mxu0 %vm227_vm2, %v768_v32 }
 0x916   :  { %2768 = vmatpush3.bf16.msra.mxu0 %v3305_v26  ;;  %2604 = vmatprep.mubr.msk.f32.mxu0 %vm3201_vm0, %v3200_v0 }
 0x917   :  { %2769 = vmatprep.subr.bf16.mxu0 %v3203_v21 }
 0x91a   :  { %2771 = vmatpush3.bf16.msra.mxu0 %v3314_v35 }
 0x91b   :  { %2773 = vmatprep.subr.bf16.mxu0 %v3352_v15 }
 0x95a   :  { %v936_v48 = vpop.f32.mrb[6].mxu1 }
 0x95b   :  { %v940_v49 = vadd.f32 %v936_v48, %v3291_v5  ;;  %v2595_v50 = vpop.f32.mrb[7].mxu1 }
 0x95d   :  { %2964 = vtanh.f32 %v940_v49  ;;  %v941_v53 = vmul.f32 0.5, %v940_v49 }
 0x95f   :  { %2966 = vtanh.f32 %v941_v53 }
 0x967   :  { %v2965_v51 = vpop.eup %2964 }
 0x968   :  { %948 = vrot.lane.b32.xlu0 %v2965_v51, %s3202_s3 }
 0x969   :  { %v2967_v55 = vpop.eup %2966 }
 0x96a   :  { %v943_v57 = vadd.f32 1.0, %v2967_v55 }
 0x96c   :  { %v944_v58 = vmul.f32 0.5, %v943_v57 }
 0x96e   :  { %v946_v2 = vmul.f32 %v944_v58, %v3413_v10 }
 0x9da   :  { %v949_v60 = vpop.permute.xlu0 %948 }
 0x9db   :  { %v951_v61 = vmul.f32 %v949_v60, %v944_v58 }
 0x9dd   :  { %953 = vrot.lane.b32.xlu1 %v951_v61, %s3202_s3 }
 0x9e8   :  { %v837_v62 = vpop.f32.mrb[4].mxu0 }
 0x9e9   :  { %v839_v63 = vpop.f32.mrb[5].mxu0  ;;  %v842_v9 = vadd.f32 %v837_v62, %v3347_v1 }
 0x9ea   :  { %v843_v6 = vadd.f32 %v839_v63, %v3335_v56 }
 0x9eb   :  { %v844_v11 = vmul.f32 0.5, %v842_v9 }
 0x9ec   :  { %v845_v32 = vmul.f32 0.5, %v843_v6 }
 0xa4f   :  { %v954_v3 = vpop.permute.xlu1 %953 }
 0xa50   :  { %v3457_v4 = vadd.f32 %v954_v3, %v946_v2 }
 0xa52   :  { %2968 = vtanh.f32 %v3457_v4 }
 0xa53   :  { %2970 = vtanh.f32 %v843_v6 }
 0xa54   :  { %2972 = vtanh.f32 %v844_v11 }
 0xa5c   :  { %v2969_v7 = vpop.eup %2968 }
 0xa5d   :  { %959 = vrot.lane.b32.xlu0 %v2969_v7, %s3202_s3  ;;  %v2971_v8 = vpop.eup %2970 }
 0xa5e   :  { %v2973_v12 = vpop.eup %2972 }
 0xa5f   :  { %v848_v10 = vadd.f32 1.0, %v2973_v12 }
 0xa61   :  { %855 = vrot.lane.b32.xlu0 %v2971_v8, %s3204_s1  ;;  %v850_v16 = vmul.f32 0.5, %v848_v10 }
 0xa63   :  { %v853_v23 = vmul.f32 %v850_v16, %v3427_v37 }
 0xacf   :  { %v960_v13 = vpop.permute.xlu0 %959 }
 0xad0   :  { %v962_v14 = vmul.f32 %v960_v13, %v944_v58 }
 0xad2   :  { %1038 = vrot.lane.b32.xlu1 %v962_v14, %s3204_s1 }
 0xad3   :  { %v856_v17 = vpop.permute.xlu0 %855 }
 0xad4   :  { %v858_v59 = vmul.f32 %v856_v17, %v850_v16 }
 0xad6   :  { %860 = vrot.lane.b32.xlu1 %v858_v59, %s3204_s1 }
 0xb44   :  { %v1039_v18 = vpop.permute.xlu1 %1038 }
 0xb45   :  { %2605 = vmatmul.mubr.msk.f32.vlgmr.msra.gmra.mrb[6].mxu0 %vm227_vm2, %v1039_v18 }
 0xb46   :  { %2775 = vmatpush1.bf16.msra.mxu0 %v3354_v19  ;;  %1301 = vmatprep.mubr.f32.mxu0 %v3200_v0 }
 0xb47   :  { %2777 = vmatprep.subr.bf16.mxu0 %v3356_v22 }
 0xb48   :  { %v861_v24 = vpop.permute.xlu1 %860 }
 0xb49   :  { %v3471_v27 = vadd.f32 %v861_v24, %v853_v23 }
 0xb4a   :  { %2779 = vmatpush1.bf16.msra.mxu0 %v3361_v29 }
 0xb4b   :  { %2974 = vtanh.f32 %v3471_v27  ;;  %2781 = vmatprep.subr.bf16.mxu0 %v3364_v31 }
 0xb4c   :  { %2976 = vtanh.f32 %v845_v32 }
 0xb4e   :  { %2783 = vmatpush1.bf16.msra.mxu0 %v3367_v38 }
 0xb4f   :  { %2785 = vmatprep.subr.bf16.mxu0 %v3370_v39 }
 0xb52   :  { %2787 = vmatpush1.bf16.msra.mxu0 %v3373_v42 }
 0xb53   :  { %2789 = vmatprep.subr.bf16.mxu0 %v3300_v20 }
 0xb55   :  { %v2975_v28 = vpop.eup %2974 }
 0xb56   :  { %866 = vrot.lane.b32.xlu0 %v2975_v28, %s3204_s1  ;;  %v2977_v33 = vpop.eup %2976 }
 0xb57   :  { %v849_v36 = vadd.f32 1.0, %v2977_v33 }
 0xb59   :  { %v851_v37 = vmul.f32 0.5, %v849_v36 }
 0xbc8   :  { %v867_v40 = vpop.permute.xlu0 %866 }
 0xbc9   :  { %v3481_v41 = vmul.f32 %v867_v40, %v851_v37 }
 0xbcb   :  { %2482 = vmatmul.mubr.msk.f32.vlgmr.msra.gmra.mrb[8].mxu1 %vm420_vm3, %v3481_v41 }
 0xbcc   :  { %2761 = vmatpush1.bf16.msra.mxu1 %v3303_v25  ;;  %1106 = vmatprep.mubr.f32.mxu1 %v3200_v0 }
 0xbcd   :  { %2763 = vmatprep.subr.bf16.mxu1 %v3308_v30 }
 0xbd0   :  { %2765 = vmatpush1.bf16.msra.mxu1 %v3312_v34 }
 0xbd1   :  { %2796 = vmatprep.subr.bf16.mxu1 %v3203_v21 }
 0xbd3   :  { %2483 = vmatmul.mubr.msk.f32.vlgmr.msra.gmra.mrb[8].mxu1 %vm227_vm2, %v1039_v18 }
 0xbd4   :  { %2798 = vmatpush3.bf16.msra.mxu1 %v3305_v26  ;;  %2615 = vmatprep.mubr.msk.f32.mxu1 %vm3201_vm0, %v3200_v0 }
 0xbd5   :  { %2799 = vmatprep.subr.bf16.mxu1 %v3203_v21 }
 0xbd8   :  { %2801 = vmatpush3.bf16.msra.mxu1 %v3314_v35 }
 0xbd9   :  { %2803 = vmatprep.subr.bf16.mxu1 %v3352_v15 }
 0xc18   :  { %v1207_v43 = vpop.f32.mrb[6].mxu0 }
 0xc19   :  { %v1211_v44 = vadd.f32 %v1207_v43, %v3291_v5  ;;  %v2606_v45 = vpop.f32.mrb[7].mxu0 }
 0xc1b   :  { %2978 = vtanh.f32 %v1211_v44  ;;  %v1212_v48 = vmul.f32 0.5, %v1211_v44 }
 0xc1d   :  { %2980 = vtanh.f32 %v1212_v48 }
 0xc25   :  { %v2979_v46 = vpop.eup %2978 }
 0xc26   :  { %1219 = vrot.lane.b32.xlu1 %v2979_v46, %s3202_s3 }
 0xc27   :  { %v2981_v49 = vpop.eup %2980 }
 0xc28   :  { %v1214_v50 = vadd.f32 1.0, %v2981_v49 }
 0xc2a   :  { %v1215_v51 = vmul.f32 0.5, %v1214_v50 }
 0xc2c   :  { %v1217_v60 = vmul.f32 %v1215_v51, %v3457_v4 }
 0xc98   :  { %v1220_v53 = vpop.permute.xlu1 %1219 }
 0xc99   :  { %v1222_v55 = vmul.f32 %v1220_v53, %v1215_v51 }
 0xc9b   :  { %1224 = vrot.lane.b32.xlu0 %v1222_v55, %s3202_s3 }
 0xca6   :  { %v1108_v57 = vpop.f32.mrb[8].mxu1 }
 0xca7   :  { %v1110_v58 = vpop.f32.mrb[9].mxu1  ;;  %v1113_v6 = vadd.f32 %v1108_v57, %v3347_v1 }
 0xca8   :  { %v1114_v63 = vadd.f32 %v1110_v58, %v3335_v56 }
 0xca9   :  { %v1115_v7 = vmul.f32 0.5, %v1113_v6 }
 0xcaa   :  { %v1116_v23 = vmul.f32 0.5, %v1114_v63 }
 0xd0d   :  { %v1225_v61 = vpop.permute.xlu0 %1224 }
 0xd0e   :  { %v3501_v62 = vadd.f32 %v1225_v61, %v1217_v60 }
 0xd10   :  { %2982 = vtanh.f32 %v3501_v62 }
 0xd11   :  { %2984 = vtanh.f32 %v1114_v63 }
 0xd12   :  { %2986 = vtanh.f32 %v1115_v7 }
 0xd1a   :  { %v2983_v2 = vpop.eup %2982 }
 0xd1b   :  { %1230 = vrot.lane.b32.xlu1 %v2983_v2, %s3202_s3  ;;  %v2985_v3 = vpop.eup %2984 }
 0xd1c   :  { %v2987_v8 = vpop.eup %2986 }
 0xd1d   :  { %v1119_v4 = vadd.f32 1.0, %v2987_v8 }
 0xd1f   :  { %1126 = vrot.lane.b32.xlu1 %v2985_v3, %s3204_s1  ;;  %v1121_v12 = vmul.f32 0.5, %v1119_v4 }
 0xd21   :  { %v1124_v16 = vmul.f32 %v1121_v12, %v3471_v27 }
 0xd8d   :  { %v1231_v9 = vpop.permute.xlu1 %1230 }
 0xd8e   :  { %v1233_v11 = vmul.f32 %v1231_v9, %v1215_v51 }
 0xd90   :  { %1309 = vrot.lane.b32.xlu0 %v1233_v11, %s3204_s1 }
 0xd91   :  { %v1127_v10 = vpop.permute.xlu1 %1126 }
 0xd92   :  { %v1129_v13 = vmul.f32 %v1127_v10, %v1121_v12 }
 0xd94   :  { %1131 = vrot.lane.b32.xlu0 %v1129_v13, %s3204_s1 }
 0xe02   :  { %v1310_v14 = vpop.permute.xlu0 %1309 }
 0xe03   :  { %2616 = vmatmul.mubr.msk.f32.vlgmr.msra.gmra.mrb[10].mxu1 %vm227_vm2, %v1310_v14 }
 0xe04   :  { %2805 = vmatpush1.bf16.msra.mxu1 %v3354_v19  ;;  %1572 = vmatprep.mubr.f32.mxu1 %v3200_v0 }
 0xe05   :  { %2807 = vmatprep.subr.bf16.mxu1 %v3356_v22 }
 0xe06   :  { %v1132_v17 = vpop.permute.xlu0 %1131 }
 0xe07   :  { %v3515_v59 = vadd.f32 %v1132_v17, %v1124_v16 }
 0xe08   :  { %2809 = vmatpush1.bf16.msra.mxu1 %v3361_v29 }
 0xe09   :  { %2988 = vtanh.f32 %v3515_v59  ;;  %2811 = vmatprep.subr.bf16.mxu1 %v3364_v31 }
 0xe0a   :  { %2990 = vtanh.f32 %v1116_v23 }
 0xe0c   :  { %2813 = vmatpush1.bf16.msra.mxu1 %v3367_v38 }
 0xe0d   :  { %2815 = vmatprep.subr.bf16.mxu1 %v3370_v39 }
 0xe10   :  { %2817 = vmatpush1.bf16.msra.mxu1 %v3373_v42 }
 0xe11   :  { %2819 = vmatprep.subr.bf16.mxu1 %v3300_v20 }
 0xe13   :  { %v2989_v18 = vpop.eup %2988 }
 0xe14   :  { %1137 = vrot.lane.b32.xlu1 %v2989_v18, %s3204_s1  ;;  %v2991_v24 = vpop.eup %2990 }
 0xe15   :  { %v1120_v27 = vadd.f32 1.0, %v2991_v24 }
 0xe17   :  { %v1122_v28 = vmul.f32 0.5, %v1120_v27 }
 0xe86   :  { %v1138_v32 = vpop.permute.xlu1 %1137 }
 0xe87   :  { %v3525_v33 = vmul.f32 %v1138_v32, %v1122_v28 }
 0xe89   :  { %2485 = vmatmul.mubr.msk.f32.vlgmr.msra.gmra.mrb[8].mxu0 %vm420_vm3, %v3525_v33 }
 0xe8a   :  { %2791 = vmatpush1.bf16.msra.mxu0 %v3303_v25  ;;  %1377 = vmatprep.mubr.f32.mxu0 %v3200_v0 }
 0xe8b   :  { %2793 = vmatprep.subr.bf16.mxu0 %v3308_v30 }
 0xe8e   :  { %2795 = vmatpush1.bf16.msra.mxu0 %v3312_v34 }
 0xe8f   :  { %2826 = vmatprep.subr.bf16.mxu0 %v3203_v21 }
 0xe91   :  { %2486 = vmatmul.mubr.msk.f32.vlgmr.msra.gmra.mrb[8].mxu0 %vm227_vm2, %v1310_v14 }
 0xe92   :  { %2828 = vmatpush3.bf16.msra.mxu0 %v3305_v26  ;;  %2626 = vmatprep.mubr.msk.f32.mxu0 %vm3201_vm0, %v3200_v0 }
 0xe93   :  { %2829 = vmatprep.subr.bf16.mxu0 %v3203_v21 }
 0xe96   :  { %2831 = vmatpush3.bf16.msra.mxu0 %v3314_v35 }
 0xe97   :  { %2833 = vmatprep.subr.bf16.mxu0 %v3352_v15 }
 0xed6   :  { %v1478_v36 = vpop.f32.mrb[10].mxu1 }
 0xed7   :  { %v1482_v37 = vadd.f32 %v1478_v36, %v3291_v5  ;;  %v2617_v40 = vpop.f32.mrb[11].mxu1 }
 0xed9   :  { %2992 = vtanh.f32 %v1482_v37  ;;  %v1483_v44 = vmul.f32 0.5, %v1482_v37 }
 0xedb   :  { %2994 = vtanh.f32 %v1483_v44 }
 0xee3   :  { %v2993_v43 = vpop.eup %2992 }
 0xee4   :  { %1490 = vrot.lane.b32.xlu0 %v2993_v43, %s3202_s3 }
 0xee5   :  { %v2995_v45 = vpop.eup %2994 }
 0xee6   :  { %v1485_v46 = vadd.f32 1.0, %v2995_v45 }
 0xee8   :  { %v1486_v48 = vmul.f32 0.5, %v1485_v46 }
 0xeea   :  { %v1488_v58 = vmul.f32 %v1486_v48, %v3501_v62 }
 0xf56   :  { %v1491_v49 = vpop.permute.xlu0 %1490 }
 0xf57   :  { %v1493_v50 = vmul.f32 %v1491_v49, %v1486_v48 }
 0xf59   :  { %1495 = vrot.lane.b32.xlu1 %v1493_v50, %s3202_s3 }
 0xf64   :  { %v1379_v51 = vpop.f32.mrb[8].mxu0 }
 0xf65   :  { %v1381_v53 = vpop.f32.mrb[9].mxu0  ;;  %v1384_v60 = vadd.f32 %v1379_v51, %v3347_v1 }
 0xf66   :  { %v1385_v55 = vadd.f32 %v1381_v53, %v3335_v56 }
 0xf67   :  { %v1386_v2 = vmul.f32 0.5, %v1384_v60 }
 0xf68   :  { %2996 = vtanh.f32 %v1385_v55  ;;  %v1387_v17 = vmul.f32 0.5, %v1385_v55 }
 0xf72   :  { %v2997_v57 = vpop.eup %2996 }
 0xf73   :  { %1397 = vrot.lane.b32.xlu1 %v2997_v57, %s3204_s1 }
 0xfcb   :  { %v1496_v61 = vpop.permute.xlu1 %1495 }
 0xfcc   :  { %v3548_v63 = vadd.f32 %v1496_v61, %v1488_v58 }
 0xfce   :  { %2998 = vtanh.f32 %v3548_v63 }
 0xfcf   :  { %3000 = vtanh.f32 %v1386_v2 }
 0xfd8   :  { %v2999_v3 = vpop.eup %2998 }
 0xfd9   :  { %1501 = vrot.lane.b32.xlu0 %v2999_v3, %s3202_s3  ;;  %v3001_v6 = vpop.eup %3000 }
 0xfda   :  { %v1390_v7 = vadd.f32 1.0, %v3001_v6 }
 0xfdc   :  { %v1392_v8 = vmul.f32 0.5, %v1390_v7 }
 0xfde   :  { %v1395_v12 = vmul.f32 %v1392_v8, %v3515_v59 }
 0xfe5   :  { %v1398_v4 = vpop.permute.xlu1 %1397 }
 0xfe6   :  { %v1400_v9 = vmul.f32 %v1398_v4, %v1392_v8 }
 0xfe8   :  { %1402 = vrot.lane.b32.xlu1 %v1400_v9, %s3204_s1 }
0x104b   :  { %v1502_v62 = vpop.permute.xlu0 %1501 }
0x104c   :  { %v1504_v11 = vmul.f32 %v1502_v62, %v1486_v48 }
0x104e   :  { %1580 = vrot.lane.b32.xlu0 %v1504_v11, %s3204_s1 }
0x105a   :  { %v1403_v10 = vpop.permute.xlu1 %1402 }
0x105b   :  { %v3555_v13 = vadd.f32 %v1403_v10, %v1395_v12 }
0x105d   :  { %3002 = vtanh.f32 %v3555_v13 }
0x105e   :  { %3004 = vtanh.f32 %v1387_v17  ;;  %v104_v17 = vld [vmem:[#allocation8 + $0x8] sm:$0xff] }
0x1067   :  { %v3003_v14 = vpop.eup %3002 }
0x1068   :  { %1408 = vrot.lane.b32.xlu0 %v3003_v14, %s3204_s1  ;;  %v3005_v59 = vpop.eup %3004 }
0x1069   :  { %v1391_v18 = vadd.f32 1.0, %v3005_v59 }
0x106b   :  { %v1393_v23 = vmul.f32 0.5, %v1391_v18  ;;  %v105_v18 = vld [vmem:[#allocation8 + $0x10] sm:$0xff] }
0x10c0   :  { %v1581_v16 = vpop.permute.xlu0 %1580 }
0x10c1   :  { %2627 = vmatmul.mubr.msk.f32.vlgmr.msra.gmra.mrb[10].mxu0 %vm227_vm2, %v1581_v16 }
0x10c2   :  { %2835 = vmatpush1.bf16.msra.mxu0 %v3354_v19  ;;  %1843 = vmatprep.mubr.f32.mxu0 %v3200_v0 }
0x10c3   :  { %2837 = vmatprep.subr.bf16.mxu0 %v3356_v22 }
0x10c6   :  { %2839 = vmatpush1.bf16.msra.mxu0 %v3361_v29 }
0x10c7   :  { %2841 = vmatprep.subr.bf16.mxu0 %v3364_v31 }
0x10ca   :  { %2843 = vmatpush1.bf16.msra.mxu0 %v3367_v38 }
0x10cb   :  { %2845 = vmatprep.subr.bf16.mxu0 %v3370_v39 }
0x10ce   :  { %2847 = vmatpush1.bf16.msra.mxu0 %v3373_v42 }
0x10cf   :  { %2849 = vmatprep.subr.bf16.mxu0 %v3300_v20 }
0x10da   :  { %v1409_v24 = vpop.permute.xlu0 %1408 }
0x10db   :  { %v3569_v27 = vmul.f32 %v1409_v24, %v1393_v23  ;;  %v106_v23 = vld [vmem:[#allocation8 + $0x18] sm:$0xff] }
0x10dc   :  { %v2890_v24 = vpack.c.bf16 %v106_v23, %v105_v18 }
0x10dd   :  { %2488 = vmatmul.mubr.msk.f32.vlgmr.msra.gmra.mrb[12].mxu1 %vm420_vm3, %v3569_v27 }
0x10de   :  { %2821 = vmatpush1.bf16.msra.mxu1 %v3303_v25  ;;  %1648 = vmatprep.mubr.f32.mxu1 %v3200_v0 }
0x10df   :  { %2823 = vmatprep.subr.bf16.mxu1 %v3308_v30 }
0x10e2   :  { %2825 = vmatpush1.bf16.msra.mxu1 %v3312_v34 }
0x10e3   :  { %2856 = vmatprep.subr.bf16.mxu1 %v3203_v21 }
0x10e5   :  { %2489 = vmatmul.mubr.msk.f32.vlgmr.msra.gmra.mrb[12].mxu1 %vm227_vm2, %v1581_v16 }
0x10e6   :  { %2858 = vmatpush3.bf16.msra.mxu1 %v3305_v26  ;;  %2637 = vmatprep.mubr.msk.f32.mxu1 %vm3201_vm0, %v3200_v0 }
0x10e7   :  { %2859 = vmatprep.subr.bf16.mxu1 %v3203_v21 }
0x10ea   :  { %2861 = vmatpush3.bf16.msra.mxu1 %v3314_v35 }
0x10eb   :  { %2863 = vmatprep.subr.bf16.mxu1 %v3352_v15 }
0x1194   :  { %v1749_v28 = vpop.f32.mrb[10].mxu0 }
0x1195   :  { %v1753_v32 = vadd.f32 %v1749_v28, %v3291_v5  ;;  %v2628_v36 = vpop.f32.mrb[11].mxu0 }
0x1196   :  { %v108_v36 = vld [vmem:[#allocation8 + $0x28] sm:$0xff] }
0x1197   :  { %3006 = vtanh.f32 %v1753_v32  ;;  %v1754_v21 = vmul.f32 0.5, %v1753_v32  ;;  %v107_v32 = vld [vmem:[#allocation8 + $0x20] sm:$0xff] }
0x11a1   :  { %v3007_v37 = vpop.eup %3006 }
0x11a2   :  { %1761 = vrot.lane.b32.xlu1 %v3007_v37, %s3202_s3  ;;  %v2894_v37 = vpack.c.bf16 %v108_v36, %v107_v32 }
0x11b8   :  { %v1650_v40 = vpop.f32.mrb[12].mxu1 }
0x11b9   :  { %v1652_v43 = vpop.f32.mrb[13].mxu1  ;;  %v1655_v49 = vadd.f32 %v1650_v40, %v3347_v1  ;;  %v109_v40 = vld [vmem:[#allocation8 + $0x30] sm:$0xff] }
0x11ba   :  { %v1656_v26 = vadd.f32 %v1652_v43, %v3335_v56  ;;  %v110_v43 = vld [vmem:[#allocation8 + $0x38] sm:$0xff] }
0x11bb   :  { %v1657_v50 = vmul.f32 0.5, %v1655_v49 }
0x11bc   :  { %3008 = vtanh.f32 %v1656_v26  ;;  %v1658_v62 = vmul.f32 0.5, %v1656_v26  ;;  %v2898_v26 = vpack.c.bf16 %v110_v43, %v109_v40 }
0x11bd   :  { %3010 = vtanh.f32 %v1754_v21 }
0x11be   :  { %3012 = vtanh.f32 %v1657_v50 }
0x11c6   :  { %v3009_v44 = vpop.eup %3008 }
0x11c7   :  { %1668 = vrot.lane.b32.xlu1 %v3009_v44, %s3204_s1  ;;  %v3011_v35 = vpop.eup %3010 }
0x11c8   :  { %v1756_v15 = vadd.f32 1.0, %v3011_v35  ;;  %v3013_v51 = vpop.eup %3012 }
0x11c9   :  { %v1661_v53 = vadd.f32 1.0, %v3013_v51 }
0x11ca   :  { %v1757_v45 = vmul.f32 0.5, %v1756_v15 }
0x11cb   :  { %v1663_v55 = vmul.f32 0.5, %v1661_v53 }
0x11cc   :  { %v1759_v60 = vmul.f32 %v1757_v45, %v3548_v63 }
0x11cd   :  { %v1666_v6 = vmul.f32 %v1663_v55, %v3555_v13  ;;  %v103_v13 = vld [vmem:[#allocation8] sm:$0xff] }
0x11ce   :  { %v2886_v59 = vpack.c.bf16 %v104_v17, %v103_v13 }
0x1214   :  { %v1762_v46 = vpop.permute.xlu1 %1761 }
0x1215   :  { %v1764_v48 = vmul.f32 %v1762_v46, %v1757_v45 }
0x1217   :  { %1766 = vrot.lane.b32.xlu0 %v1764_v48, %s3202_s3 }
0x1239   :  { %v1669_v57 = vpop.permute.xlu1 %1668 }
0x123a   :  { %v1671_v58 = vmul.f32 %v1669_v57, %v1663_v55 }
0x123c   :  { %1673 = vrot.lane.b32.xlu1 %v1671_v58, %s3204_s1 }
0x1289   :  { %v1767_v61 = vpop.permute.xlu0 %1766 }
0x128a   :  { %v3593_v2 = vadd.f32 %v1767_v61, %v1759_v60 }
0x128c   :  { %3014 = vtanh.f32 %v3593_v2 }
0x1296   :  { %v3015_v3 = vpop.eup %3014 }
0x1297   :  { %1772 = vrot.lane.b32.xlu0 %v3015_v3, %s3202_s3 }
0x12ae   :  { %v1674_v7 = vpop.permute.xlu1 %1673 }
0x12af   :  { %v3598_v8 = vadd.f32 %v1674_v7, %v1666_v6 }
0x12b1   :  { %3016 = vtanh.f32 %v3598_v8 }
0x12b2   :  { %3018 = vtanh.f32 %v1658_v62  ;;  %v3681_v62 = vand.u32 127, %v214_v52 }
0x12b4   :  { %vm2427_vm5 = vcmp.lt.s32.totalorder %v3681_v62, 16  ;;  %vm2428_vm6 = vcmp.lt.s32.totalorder %v3681_v62, 32 }
0x12bb   :  { %v3017_v4 = vpop.eup %3016 }
0x12bc   :  { %1679 = vrot.lane.b32.xlu1 %v3017_v4, %s3204_s1  ;;  %v3019_v11 = vpop.eup %3018 }
0x12bd   :  { %v1662_v12 = vadd.f32 1.0, %v3019_v11 }
0x12bf   :  { %v1664_v10 = vmul.f32 0.5, %v1662_v12 }
0x1309   :  { %v1773_v9 = vpop.permute.xlu0 %1772 }
0x130a   :  { %v1775_v63 = vmul.f32 %v1773_v9, %v1757_v45 }
0x130c   :  { %1851 = vrot.lane.b32.xlu0 %v1775_v63, %s3204_s1 }
0x132e   :  { %v1680_v14 = vpop.permute.xlu1 %1679 }
0x132f   :  { %v1682_v16 = vmul.f32 %v1680_v14, %v1664_v10 }
0x1331   :  { %2491 = vmatmul.mubr.msk.f32.vlgmr.msra.gmra.mrb[12].mxu0 %vm420_vm3, %v1682_v16 }
0x1332   :  { %2851 = vmatpush1.bf16.msra.mxu0 %v3303_v25  ;;  %1919 = vmatprep.mubr.f32.mxu0 %v3200_v0 }
0x1333   :  { %2853 = vmatprep.subr.bf16.mxu0 %v3308_v30 }
0x1336   :  { %2855 = vmatpush1.bf16.msra.mxu0 %v3312_v34 }
0x1337   :  { %2887 = vmatprep.subr.bf16.mxu0 %v2886_v59 }
0x137e   :  { %v1852_v28 = vpop.permute.xlu0 %1851 }
0x137f   :  { %2492 = vmatmul.mubr.msk.f32.vlgmr.msra.gmra.mrb[12].mxu0 %vm227_vm2, %v1852_v28  ;;  %2638 = vmatmul.mubr.msk.f32.vlgmr.msra.gmra.mrb[14].mxu1 %vm227_vm2, %v1852_v28 }
0x1380   :  { %2889 = vmatpush3.bf16.msra.mxu0 %v2886_v59  ;;  %2656 = vmatprep.mubr.msk.f32.mxu0 %vm420_vm3, %v3393_v54  ;;  %v3641_v54 = vld [vmem:[#allocation8 + $0x40] ss:$0 sm:$0xff] }
0x1381   :  { %2891 = vmatprep.subr.bf16.mxu0 %v2890_v24  ;;  %2865 = vmatpush1.bf16.msra.mxu1 %v3354_v19 }
0x1382   :  { %2867 = vmatprep.subr.bf16.mxu1 %v3356_v22  ;;  %2114 = vmatprep.mubr.f32.mxu1 %v3200_v0 }
0x1384   :  { %2893 = vmatpush3.bf16.msra.mxu0 %v2890_v24 }
0x1385   :  { %2895 = vmatprep.subr.bf16.mxu0 %v2894_v37  ;;  %2869 = vmatpush1.bf16.msra.mxu1 %v3361_v29 }
0x1386   :  { %2871 = vmatprep.subr.bf16.mxu1 %v3364_v31 }
0x1388   :  { %2897 = vmatpush3.bf16.msra.mxu0 %v2894_v37 }
0x1389   :  { %2899 = vmatprep.subr.bf16.mxu0 %v2898_v26  ;;  %2873 = vmatpush1.bf16.msra.mxu1 %v3367_v38 }
0x138a   :  { %2875 = vmatprep.subr.bf16.mxu1 %v3370_v39 }
0x138c   :  { %2901 = vmatpush3.bf16.msra.mxu0 %v2898_v26 }
0x138d   :  { %2877 = vmatpush1.bf16.msra.mxu1 %v3373_v42 }
0x138e   :  { %2879 = vmatprep.subr.bf16.mxu1 %v3300_v20 }
0x138f   :  { %2657 = vmatmul.mubr.msk.f32.vlgmr.msra.gmra.mrb[14].mxu0 %vm420_vm3, %v3437_v47 }
0x1390   :  { %2659 = vmatprep.mubr.msk.f32.mxu0 %vm420_vm3, %v3481_v41 }
0x1393   :  { %2660 = vmatmul.mubr.msk.f32.gmra.mrb[16].mxu0 %vm420_vm3, %v3525_v33 }
0x1394   :  { %2662 = vmatprep.mubr.msk.f32.mxu0 %vm420_vm3, %v3569_v27 }
0x1397   :  { %2663 = vmatmul.mubr.msk.f32.gmra.mrb[18].mxu0 %vm420_vm3, %v1682_v16 }
0x1452   :  { %v3630_v19 = vpop.f32.mrb[12].mxu0  ;;  %v2020_v22 = vpop.f32.mrb[14].mxu1 }
0x1453   :  { %v3633_v29 = vadd.f32 %v2020_v22, %v3291_v5  ;;  %v1923_v20 = vpop.f32.mrb[13].mxu0  ;;  %v2639_v31 = vpop.f32.mrb[15].mxu1 }
0x1454   :  { %v3636_v38 = vadd.f32 %v1923_v20, %v3335_v56 }
0x1455   :  { %3020 = vtanh.f32 %v3633_v29 }
0x1456   :  { %3022 = vtanh.f32 %v3636_v38 }
0x145f   :  { %v3021_v39 = vpop.eup %3020 }
0x1460   :  { %v3023_v42 = vpop.eup %3022  ;;  %2032 = vrot.lane.b32.xlu0 %v3021_v39, %s3202_s3 }
0x1461   :  { %1939 = vrot.lane.b32.xlu1 %v3023_v42, %s3204_s1 }
0x1462   :  { %v2658_v47 = vpop.f32.mrb[14].mxu0 }
0x1463   :  { %v3645_v5 = vadd.f32 %v2658_v47, %v3641_v54  ;;  %v2298_v41 = vpop.f32.mrb[15].mxu0 }
0x1464   :  { %v3648_v33 = vadd.f32 %v3641_v54, %v2298_v41 }
0x1465   :  { %v2348_v27 = vmul.f32 %v3645_v5, %v3645_v5  ;;  %3024 = vtanh.f32 %v3645_v5  ;;  %vm2340_vm4 = vcmp.gt.f32.partialorder %v3645_v5, 0.0 }
0x1466   :  { %v2347_v44 = vmul.f32 %v3648_v33, %v3648_v33  ;;  %3026 = vtanh.f32 %v3648_v33  ;;  %v2661_v21 = vpop.f32.mrb[16].mxu0  ;;  %vm2339_vm7 = vcmp.gt.f32.partialorder %v3648_v33, 0.0 }
0x1467   :  { %v2356_v35 = vadd.f32 1.0, %v2348_v27  ;;  %v3657_v15 = vadd.f32 %v2661_v21, %v3641_v54  ;;  %v2308_v45 = vpop.f32.mrb[17].mxu0 }
0x1468   :  { %v2355_v46 = vadd.f32 1.0, %v2347_v44  ;;  %v3660_v48 = vadd.f32 %v3641_v54, %v2308_v45 }
0x1469   :  { %3028 = vrsqrt.f32 %v2356_v35  ;;  %v2350_v49 = vmul.f32 %v3657_v15, %v3657_v15  ;;  %vm2342_vm8 = vcmp.gt.f32.partialorder %v3657_v15, 0.0 }
0x146a   :  { %3030 = vrsqrt.f32 %v2355_v46  ;;  %v2349_v50 = vmul.f32 %v3660_v48, %v3660_v48  ;;  %v2664_v51 = vpop.f32.mrb[18].mxu0  ;;  %vm2341_vm9 = vcmp.gt.f32.partialorder %v3660_v48, 0.0 }
0x146b   :  { %v2358_v53 = vadd.f32 1.0, %v2350_v49  ;;  %3032 = vtanh.f32 %v3657_v15  ;;  %v3668_v55 = vadd.f32 %v2664_v51, %v3641_v54  ;;  %v2318_v57 = vpop.f32.mrb[19].mxu0 }
0x146c   :  { %v2357_v58 = vadd.f32 1.0, %v2349_v50  ;;  %3034 = vtanh.f32 %v3660_v48  ;;  %v3672_v60 = vadd.f32 %v3641_v54, %v2318_v57 }
0x146d   :  { %3036 = vrsqrt.f32 %v2358_v53  ;;  %v2352_v61 = vmul.f32 %v3668_v55, %v3668_v55  ;;  %vm2344_vm10 = vcmp.gt.f32.partialorder %v3668_v55, 0.0 }
0x146e   :  { %3038 = vrsqrt.f32 %v2357_v58  ;;  %v2351_v3 = vmul.f32 %v3672_v60, %v3672_v60  ;;  %vm2343_vm11 = vcmp.gt.f32.partialorder %v3672_v60, 0.0 }
0x146f   :  { %v3025_v6 = vpop.eup %3024  ;;  %v2360_v7 = vadd.f32 1.0, %v2352_v61  ;;  %3040 = vtanh.f32 %v3668_v55 }
0x1470   :  { %v3027_v4 = vpop.eup %3026  ;;  %v2404_v9 = vmul.f32 0.999, %v3025_v6  ;;  %v2359_v63 = vadd.f32 1.0, %v2351_v3  ;;  %3042 = vtanh.f32 %v3672_v60 }
0x1471   :  { %v2403_v11 = vmul.f32 0.999, %v3027_v4  ;;  %3044 = vrsqrt.f32 %v2360_v7 }
0x1472   :  { %3046 = vrsqrt.f32 %v2359_v63  ;;  %v2412_v10 = vadd.f32 1.0, %v2404_v9 }
0x1473   :  { %v3029_v12 = vpop.eup %3028  ;;  %v2411_v13 = vadd.f32 1.0, %v2403_v11 }
0x1474   :  { %v3031_v14 = vpop.eup %3030  ;;  %v2372_v16 = vmul.f32 %v3029_v12, %v3645_v5  ;;  %v2420_v32 = vmul.f32 0.5, %v2412_v10 }
0x1475   :  { %v3033_v17 = vpop.eup %3032  ;;  %v2371_v59 = vmul.f32 %v3031_v14, %v3648_v33  ;;  %v2419_v26 = vmul.f32 0.5, %v2411_v13 }
0x1476   :  { %v3035_v52 = vpop.eup %3034  ;;  %v2380_v18 = vsel %vm2340_vm4, %v3645_v5, %v2372_v16  ;;  %v2406_v23 = vmul.f32 0.999, %v3033_v17 }
0x1477   :  { %v3037_v24 = vpop.eup %3036  ;;  %v2388_v28 = vadd.f32 1.005, %v2380_v18  ;;  %v2379_v36 = vsel %vm2339_vm7, %v3648_v33, %v2371_v59  ;;  %v2405_v37 = vmul.f32 0.999, %v3035_v52  ;;  %v1926_v52 = vadd.f32 %v3630_v19, %v3347_v1 }
0x1478   :  { %v3039_v40 = vpop.eup %3038  ;;  %v2387_v43 = vadd.f32 1.005, %v2379_v36  ;;  %v2374_v22 = vmul.f32 %v3037_v24, %v3657_v15  ;;  %v2414_v20 = vadd.f32 1.0, %v2406_v23  ;;  %v2025_v18 = vmul.f32 0.5, %v3633_v29 }
0x1479   :  { %v3041_v31 = vpop.eup %3040  ;;  %v2430_v39 = vsel %vm2428_vm6, %v2388_v28, %v2420_v32  ;;  %v2373_v42 = vmul.f32 %v3039_v40, %v3660_v48  ;;  %v2413_v47 = vadd.f32 1.0, %v2405_v37  ;;  %v1928_v23 = vmul.f32 0.5, %v1926_v52 }
0x147a   :  { %v3043_v41 = vpop.eup %3042  ;;  %v2438_v27 = vsel %vm2427_vm5, %v3645_v5, %v2430_v39  ;;  %v2429_v44 = vsel %vm2428_vm6, %v2387_v43, %v2419_v26  ;;  %v2382_v21 = vsel %vm2342_vm8, %v3657_v15, %v2374_v22  ;;  %v2422_v35 = vmul.f32 0.5, %v2414_v20 }
0x147b   :  { %v3045_v45 = vpop.eup %3044  ;;  %2446 = vst [vmem:[#allocation10 + $0x8] sm:$0xff] %v2438_v27  ;;  %v2437_v46 = vsel %vm2427_vm5, %v3648_v33, %v2429_v44  ;;  %v2390_v49 = vadd.f32 1.005, %v2382_v21  ;;  %v2381_v50 = vsel %vm2341_vm9, %v3660_v48, %v2373_v42  ;;  %v2421_v51 = vmul.f32 0.5, %v2413_v47 }
0x147c   :  { %v3047_v53 = vpop.eup %3046  ;;  %2445 = vst [vmem:[#allocation10] sm:$0xff] %v2437_v46  ;;  %v2389_v5 = vadd.f32 1.005, %v2381_v50  ;;  %v2376_v57 = vmul.f32 %v3045_v45, %v3668_v55  ;;  %v2408_v58 = vmul.f32 0.999, %v3041_v31  ;;  %3048 = vtanh.f32 %v2025_v18 }
0x147d   :  { %v2407_v61 = vmul.f32 0.999, %v3043_v41  ;;  %v2432_v3 = vsel %vm2428_vm6, %v2390_v49, %v2422_v35  ;;  %v2375_v33 = vmul.f32 %v3047_v53, %v3672_v60  ;;  %3050 = vtanh.f32 %v1928_v23 }
0x147e   :  { %v2440_v6 = vsel %vm2427_vm5, %v3657_v15, %v2432_v3  ;;  %v2431_v7 = vsel %vm2428_vm6, %v2389_v5, %v2421_v51  ;;  %v2384_v4 = vsel %vm2344_vm10, %v3668_v55, %v2376_v57  ;;  %v2416_v9 = vadd.f32 1.0, %v2408_v58 }
0x147f   :  { %2448 = vst [vmem:[#allocation10 + $0x18] sm:$0xff] %v2440_v6  ;;  %v2439_v63 = vsel %vm2427_vm5, %v3660_v48, %v2431_v7  ;;  %v2392_v11 = vadd.f32 1.005, %v2384_v4  ;;  %v2383_v12 = vsel %vm2343_vm11, %v3672_v60, %v2375_v33  ;;  %v2415_v10 = vadd.f32 1.0, %v2407_v61 }
0x1480   :  { %2447 = vst [vmem:[#allocation10 + $0x10] sm:$0xff] %v2439_v63  ;;  %v2424_v14 = vmul.f32 0.5, %v2416_v9  ;;  %v2391_v16 = vadd.f32 1.005, %v2383_v12  ;;  %v1929_v41 = vmul.f32 0.5, %v3636_v38 }
0x1481   :  { %v2423_v13 = vmul.f32 0.5, %v2415_v10 }
0x1482   :  { %v2434_v15 = vsel %vm2428_vm6, %v2392_v11, %v2424_v14 }
0x1483   :  { %v2442_v17 = vsel %vm2427_vm5, %v3668_v55, %v2434_v15  ;;  %v2433_v59 = vsel %vm2428_vm6, %v2391_v16, %v2423_v13 }
0x1484   :  { %2450 = vst [vmem:[#allocation10 + $0x28] sm:$0xff] %v2442_v17  ;;  %v2441_v48 = vsel %vm2427_vm5, %v3672_v60, %v2433_v59 }
0x1485   :  { %2449 = vst [vmem:[#allocation10 + $0x20] sm:$0xff] %v2441_v48 }
0x1486   :  { %v3049_v24 = vpop.eup %3048 }
0x1487   :  { %v3051_v28 = vpop.eup %3050  ;;  %v2027_v55 = vadd.f32 1.0, %v3049_v24 }
0x1488   :  { %v1932_v32 = vadd.f32 1.0, %v3051_v28 }
0x1489   :  { %v2028_v36 = vmul.f32 0.5, %v2027_v55 }
0x148a   :  { %v1934_v40 = vmul.f32 0.5, %v1932_v32 }
0x148b   :  { %v2030_v19 = vmul.f32 %v2028_v36, %v3593_v2 }
0x148c   :  { %v1937_v60 = vmul.f32 %v1934_v40, %v3598_v8 }
0x14d2   :  { %v2033_v37 = vpop.permute.xlu0 %2032 }
0x14d3   :  { %v2035_v43 = vmul.f32 %v2033_v37, %v2028_v36  ;;  %v1940_v26 = vpop.permute.xlu1 %1939 }
0x14d4   :  { %v1942_v22 = vmul.f32 %v1940_v26, %v1934_v40 }
0x14d5   :  { %2037 = vrot.lane.b32.xlu0 %v2035_v43, %s3202_s3 }
0x14d6   :  { %1944 = vrot.lane.b32.xlu1 %v1942_v22, %s3204_s1 }
0x1547   :  { %v2038_v29 = vpop.permute.xlu0 %2037 }
0x1548   :  { %v2040_v20 = vadd.f32 %v2038_v29, %v2030_v19  ;;  %v1945_v31 = vpop.permute.xlu1 %1944 }
0x1549   :  { %v1947_v39 = vadd.f32 %v1945_v31, %v1937_v60 }
0x154a   :  { %3052 = vtanh.f32 %v2040_v20 }
0x154b   :  { %3054 = vtanh.f32 %v1947_v39 }
0x154c   :  { %3056 = vtanh.f32 %v1929_v41 }
0x1554   :  { %v3053_v42 = vpop.eup %3052 }
0x1555   :  { %v3055_v47 = vpop.eup %3054  ;;  %2043 = vrot.lane.b32.xlu0 %v3053_v42, %s3202_s3 }
0x1556   :  { %1950 = vrot.lane.b32.xlu1 %v3055_v47, %s3204_s1  ;;  %v3057_v27 = vpop.eup %3056 }
0x1557   :  { %v1933_v44 = vadd.f32 1.0, %v3057_v27 }
0x1559   :  { %v1935_v21 = vmul.f32 0.5, %v1933_v44 }
0x15c7   :  { %v2044_v2 = vpop.permute.xlu0 %2043 }
0x15c8   :  { %v2046_v35 = vmul.f32 %v2044_v2, %v2028_v36  ;;  %v1951_v8 = vpop.permute.xlu1 %1950 }
0x15c9   :  { %v1953_v45 = vmul.f32 %v1951_v8, %v1935_v21 }
0x15ca   :  { %2122 = vrot.lane.b32.xlu0 %v2046_v35, %s3204_s1 }
0x15cb   :  { %2494 = vmatmul.mubr.msk.f32.vlgmr.msra.gmra.mrb[16].mxu1 %vm420_vm3, %v1953_v45  ;;  %2665 = vmatprep.mubr.msk.f32.mxu0 %vm420_vm3, %v1953_v45 }
0x15cc   :  { %2881 = vmatpush1.bf16.msra.mxu1 %v3303_v25  ;;  %2190 = vmatprep.mubr.f32.mxu1 %v3200_v0 }
0x15cd   :  { %2883 = vmatprep.subr.bf16.mxu1 %v3308_v30 }
0x15d0   :  { %2885 = vmatpush1.bf16.msra.mxu1 %v3312_v34 }
0x163c   :  { %v2123_v38 = vpop.permute.xlu0 %2122 }
0x163d   :  { %2495 = vmatmul.mubr.msk.f32.vlgmr.msra.gmra.mrb[16].mxu1 %vm227_vm2, %v2123_v38 }
0x1710   :  { %v2192_v46 = vpop.f32.mrb[16].mxu1 }
0x1711   :  { %v2194_v49 = vpop.f32.mrb[17].mxu1  ;;  %v2197_v53 = vadd.f32 %v2192_v46, %v3347_v1 }
0x1712   :  { %v2198_v50 = vadd.f32 %v2194_v49, %v3335_v56 }
0x1713   :  { %v2199_v25 = vmul.f32 0.5, %v2197_v53 }
0x1714   :  { %3058 = vtanh.f32 %v2198_v50  ;;  %v2200_v33 = vmul.f32 0.5, %v2198_v50 }
0x1715   :  { %3060 = vtanh.f32 %v2199_v25 }
0x171e   :  { %v3059_v51 = vpop.eup %3058 }
0x171f   :  { %2210 = vrot.lane.b32.xlu1 %v3059_v51, %s3204_s1  ;;  %v3061_v0 = vpop.eup %3060 }
0x1720   :  { %v2203_v5 = vadd.f32 1.0, %v3061_v0 }
0x1722   :  { %v2205_v30 = vmul.f32 0.5, %v2203_v5 }
0x1724   :  { %v2208_v58 = vmul.f32 %v2205_v30, %v1947_v39 }
0x1791   :  { %v2211_v57 = vpop.permute.xlu1 %2210 }
0x1792   :  { %v2213_v34 = vmul.f32 %v2211_v57, %v2205_v30 }
0x1794   :  { %2215 = vrot.lane.b32.xlu0 %v2213_v34, %s3204_s1 }
0x1806   :  { %v2216_v61 = vpop.permute.xlu0 %2215 }
0x1807   :  { %v2218_v3 = vadd.f32 %v2216_v61, %v2208_v58 }
0x1809   :  { %3062 = vtanh.f32 %v2218_v3 }
0x180a   :  { %3064 = vtanh.f32 %v2200_v33 }
0x1813   :  { %v3063_v56 = vpop.eup %3062 }
0x1814   :  { %2221 = vrot.lane.b32.xlu1 %v3063_v56, %s3204_s1  ;;  %v3065_v6 = vpop.eup %3064 }
0x1815   :  { %v2204_v1 = vadd.f32 1.0, %v3065_v6 }
0x1817   :  { %v2206_v7 = vmul.f32 0.5, %v2204_v1 }
0x1886   :  { %v2222_v4 = vpop.permute.xlu1 %2221 }
0x1887   :  { %v2224_v9 = vmul.f32 %v2222_v4, %v2206_v7 }
0x1889   :  { %2666 = vmatmul.mubr.msk.f32.gmra.mrb[20].mxu0 %vm420_vm3, %v2224_v9 }
0x195c   :  { %v2667_v63 = vpop.f32.mrb[20].mxu0 }
0x195d   :  { %v2334_v11 = vadd.f32 %v2667_v63, %v3641_v54  ;;  %v2328_v12 = vpop.f32.mrb[21].mxu0 }
0x195e   :  { %v2329_v10 = vadd.f32 %v3641_v54, %v2328_v12 }
0x195f   :  { %v2354_v14 = vmul.f32 %v2334_v11, %v2334_v11  ;;  %3066 = vtanh.f32 %v2334_v11  ;;  %vm2346_vm12 = vcmp.gt.f32.partialorder %v2334_v11, 0.0 }
0x1960   :  { %v2353_v16 = vmul.f32 %v2329_v10, %v2329_v10  ;;  %3068 = vtanh.f32 %v2329_v10  ;;  %vm2345_vm13 = vcmp.gt.f32.partialorder %v2329_v10, 0.0 }
0x1961   :  { %v2362_v13 = vadd.f32 1.0, %v2354_v14 }
0x1962   :  { %v2361_v15 = vadd.f32 1.0, %v2353_v16 }
0x1963   :  { %3070 = vrsqrt.f32 %v2362_v13 }
0x1964   :  { %3072 = vrsqrt.f32 %v2361_v15 }
0x1969   :  { %v3067_v17 = vpop.eup %3066 }
0x196a   :  { %v3069_v59 = vpop.eup %3068  ;;  %v2410_v48 = vmul.f32 0.999, %v3067_v17 }
0x196b   :  { %v2409_v52 = vmul.f32 0.999, %v3069_v59 }
0x196c   :  { %v2418_v23 = vadd.f32 1.0, %v2410_v48 }
0x196d   :  { %v3071_v18 = vpop.eup %3070  ;;  %v2417_v55 = vadd.f32 1.0, %v2409_v52 }
0x196e   :  { %v3073_v24 = vpop.eup %3072  ;;  %v2378_v28 = vmul.f32 %v3071_v18, %v2334_v11  ;;  %v2426_v37 = vmul.f32 0.5, %v2418_v23 }
0x196f   :  { %v2377_v32 = vmul.f32 %v3073_v24, %v2329_v10  ;;  %v2425_v26 = vmul.f32 0.5, %v2417_v55 }
0x1970   :  { %v2386_v54 = vsel %vm2346_vm12, %v2334_v11, %v2378_v28 }
0x1971   :  { %v2394_v36 = vadd.f32 1.005, %v2386_v54  ;;  %v2385_v40 = vsel %vm2345_vm13, %v2329_v10, %v2377_v32 }
0x1972   :  { %v2393_v43 = vadd.f32 1.005, %v2385_v40 }
0x1973   :  { %v2436_v22 = vsel %vm2428_vm6, %v2394_v36, %v2426_v37 }
0x1974   :  { %v2444_v19 = vsel %vm2427_vm5, %v2334_v11, %v2436_v22  ;;  %v2435_v29 = vsel %vm2428_vm6, %v2393_v43, %v2425_v26 }
0x1975   :  { %2452 = vst [vmem:[#allocation10 + $0x38] sm:$0xff] %v2444_v19  ;;  %v2443_v60 = vsel %vm2427_vm5, %v2329_v10, %v2435_v29 }
0x1976   :  { %2451 = vst [vmem:[#allocation10 + $0x30] sm:$0xff] %v2443_v60 }
0x1977   :  { %3173 = shalt.err (!%p3170_p8)
}
0x1978   :  { %s3174_s19 = scalar_lea.hbm %s3788_s4, 1024 }
0x1979   :  { %p3175_p9 = scmp.ne.s32.totalorder %s3788_s4, %s3174_s19  ;;  %p3178_p10 = scmp.lt.u32.totalorder %s3174_s19, %s3788_s4 }
0x197b   :  { %p3180_p11 = pnand %p3178_p10, %p3175_p9 }
0x197d   :  { %3183 = shalt.err (!%p3180_p11)
}
0x197e   :  { %2464 = dma.vmem_to_hbm [thread:$0]  %s2459_s15, 1024, %s3788_s4, [#allocation4], %s3193_s25, %s3193_s25, %s3194_s26  }
0x197f   :  { %3190 = dma.done.wait [#allocation4], 1024  }
0x1980   :  { %3191 = vsyncadd [#allocation4], 4294966272 }
0x1981   :  { %2468 = vsyncpa [#allocation3], 1 }
0x1982   :  { %2469 = vsyncpa [#allocation6], 1 }
0x1983   :  { %2470 = vsyncpa [#allocation9], 1 }
0x1984   :  { %2471 = vsyncpa [#allocation4], 1 }

</bundles_post_ra>
